<compile_context>
chip_gen: v6e
topology: v6e:2x2x1
jax: 0.10.0
libtpu: 0.0.40
codegen_flags: <defaults>
</compile_context>

<pallas_src>
import jax
import jax.numpy as jnp
from jax.experimental import pallas as pl
from jax.experimental.pallas import tpu as pltpu

N_EMBD = 64
BLOCK_SIZE = 32
N_HEAD = 4
HEAD_SIZE = N_EMBD // N_HEAD
LN_EPS = 1e-5


def transformer_block_kernel(x_ref, bias_ref, vecs_ref, b1_ref,
                             wqkv_ref, wproj_ref, w1_ref, w2_ref, o_ref):
    BT, C = x_ref.shape
    HS = HEAD_SIZE

    x = x_ref[...].astype(jnp.float32)            # (BT, C) f32 slab

    vecs = vecs_ref[...]                          # packed small params (8, C)
    ln1_g, ln1_b, bproj = vecs[0], vecs[1], vecs[2]
    ln2_g, ln2_b, b2 = vecs[3], vecs[4], vecs[5]
    b1 = b1_ref[0]                                # (4C,)

    def layernorm(v, g, b):
        mu = jnp.mean(v, axis=-1, keepdims=True)
        var = jnp.mean((v - mu) ** 2, axis=-1, keepdims=True)
        return (v - mu) * jax.lax.rsqrt(var + LN_EPS) * g + b

    # ---- self-attention on LN1(x) ----
    h = layernorm(x, ln1_g, ln1_b)
    # single fused QKV matmul (lane-dense N = 3C) + one bf16 downcast of result
    qkv = jnp.dot(h.astype(jnp.bfloat16), wqkv_ref[...],
                  preferred_element_type=jnp.float32)        # (BT, 3C) f32
    qkv = qkv.astype(jnp.bfloat16)

    # additive bias: causal within each batch block, -1e30 across blocks
    bias = bias_ref[...]                                     # (BT, BT) f32
    scale = HS ** -0.5

    heads = []
    for hd in range(N_HEAD):                                 # 4 heads, static
        qh = qkv[:, hd * HS:(hd + 1) * HS]                   # (BT, HS) bf16
        kh = qkv[:, C + hd * HS:C + (hd + 1) * HS]
        vh = qkv[:, 2 * C + hd * HS:2 * C + (hd + 1) * HS]

        s = jnp.dot(qh, kh.T, preferred_element_type=jnp.float32) * scale
        s = s + bias
        m = jnp.max(s, axis=-1, keepdims=True)
        e = jnp.exp(s - m)
        denom = jnp.sum(e, axis=-1, keepdims=True)           # (BT, 1), >= 1
        oh = jnp.dot(e.astype(jnp.bfloat16), vh,
                     preferred_element_type=jnp.float32)     # (BT, HS)
        # deferred softmax normalization; approx reciprocal runs on the EUP.
        # ~1e-3 relative error, well within the 1e-2 validation tolerance.
        heads.append(oh * pl.reciprocal(denom, approx=True))

    att = jnp.concatenate(heads, axis=-1)                    # (BT, C)
    att = jnp.dot(att.astype(jnp.bfloat16), wproj_ref[...],
                  preferred_element_type=jnp.float32) + bproj
    x = x + att                                              # residual 1

    # ---- MLP on LN2(x) ----
    h2 = layernorm(x, ln2_g, ln2_b)
    ff = jnp.dot(h2.astype(jnp.bfloat16), w1_ref[...],
                 preferred_element_type=jnp.float32) + b1
    ff = jnp.maximum(ff, 0.0)                                # ReLU
    ff = jnp.dot(ff.astype(jnp.bfloat16), w2_ref[...],
                 preferred_element_type=jnp.float32) + b2
    o_ref[...] = (x + ff).astype(o_ref.dtype)                # residual 2
    # TODO(synk): dropout is a no-op (p=0.0 in the reference module), so omitted.


def prepare_kernel_params(params):
    """Pack tiny vector params and fuse/cast matmul weights."""
    (ln1_g, ln1_b, wq, wk, wv, wproj, bproj,
     ln2_g, ln2_b, w1, b1, w2, b2) = params
    C = N_EMBD
    vecs = jnp.zeros((8, C), jnp.float32)
    vecs = vecs.at[0].set(ln1_g).at[1].set(ln1_b).at[2].set(bproj)
    vecs = vecs.at[3].set(ln2_g).at[4].set(ln2_b).at[5].set(b2)
    b1_2d = b1.reshape(1, 4 * C).astype(jnp.float32)
    wqkv = jnp.concatenate([wq, wk, wv], axis=1).astype(jnp.bfloat16)  # (C, 3C)
    return (vecs, b1_2d, wqkv,
            wproj.astype(jnp.bfloat16),
            w1.astype(jnp.bfloat16),
            w2.astype(jnp.bfloat16))


def _pick_bt(B):
    """Largest batch tile <= 4 (block-diag attention stays cheap) such that the
    grid has >= 2 steps whenever B >= 2 (keeps both v7x TensorCores busy)."""
    best = 1
    for d in range(1, B + 1):
        if B % d == 0 and d <= 4 and (B < 2 or B // d >= 2):
            best = d
    return best


def _build_bias(bt, T):
    """Additive attention bias for a (bt*T, bt*T) block-diagonal score matrix:
    0 where (same batch block AND causal), -1e30 elsewhere."""
    r = jnp.arange(bt * T)
    blk = r // T
    pos = r % T
    ok = (blk[:, None] == blk[None, :]) & (pos[:, None] >= pos[None, :])
    return jnp.where(ok, 0.0, -1e30).astype(jnp.float32)


def transformer_block(x, params):
    B, T, C = x.shape
    assert C == N_EMBD and T <= BLOCK_SIZE

    bt = _pick_bt(B)
    grid = (B // bt,)
    rows = bt * T

    vecs, b1_2d, wqkv, wproj, w1, w2 = prepare_kernel_params(params)
    bias = _build_bias(bt, T)

    # Wrapper-side reshape: 2-D (B*T, C) slab, free layout plumbing.
    x2d = x.reshape(B * T, C)

    const = lambda shape: pl.BlockSpec(shape, lambda i: (0,) * len(shape))

    out2d = pl.pallas_call(
        transformer_block_kernel,
        out_shape=jax.ShapeDtypeStruct((B * T, C), x.dtype),
        grid_spec=pltpu.PrefetchScalarGridSpec(
            num_scalar_prefetch=0,
            grid=grid,
            in_specs=[
                pl.BlockSpec((rows, C), lambda i: (i, 0)),   # x slab
                const(bias.shape),                            # causal bias
                const(vecs.shape),                            # packed vectors
                const(b1_2d.shape),                           # MLP bias 1
                const(wqkv.shape),                            # fused QKV weight
                const(wproj.shape),                           # out projection
                const(w1.shape),                              # MLP weight 1
                const(w2.shape),                              # MLP weight 2
            ],
            out_specs=pl.BlockSpec((rows, C), lambda i: (i, 0)),
        ),
        compiler_params=pltpu.CompilerParams(
            dimension_semantics=("parallel",)),
    )(x2d, bias, vecs, b1_2d, wqkv, wproj, w1, w2)
    return out2d.reshape(B, T, C)


def init_params(key):
    """Deterministic synthetic parameters matching the PyTorch module shapes."""
    ks = jax.random.split(key, 9)
    s = 0.02
    C = N_EMBD
    ln1_g = jnp.ones((C,), jnp.float32)
    ln1_b = jnp.zeros((C,), jnp.float32)
    # Per-head (n_embd, head_size) weights concatenated along the output dim
    # (column block h*HS:(h+1)*HS belongs to head h) so the kernel does y = x @ W.
    wq = jax.random.normal(ks[0], (C, C), jnp.float32) * s
    wk = jax.random.normal(ks[1], (C, C), jnp.float32) * s
    wv = jax.random.normal(ks[2], (C, C), jnp.float32) * s
    wproj = jax.random.normal(ks[3], (C, C), jnp.float32) * s
    bproj = jax.random.normal(ks[4], (C,), jnp.float32) * s
    ln2_g = jnp.ones((C,), jnp.float32)
    ln2_b = jnp.zeros((C,), jnp.float32)
    w1 = jax.random.normal(ks[5], (C, 4 * C), jnp.float32) * s
    b1 = jax.random.normal(ks[6], (4 * C,), jnp.float32) * s
    w2 = jax.random.normal(ks[7], (4 * C, C), jnp.float32) * s
    b2 = jax.random.normal(ks[8], (C,), jnp.float32) * s
    return (ln1_g, ln1_b, wq, wk, wv, wproj, bproj, ln2_g, ln2_b, w1, b1, w2, b2)


def reference_block(x, params):
    """Pure-JAX f32 reference with identical semantics (for validation)."""
    (ln1_g, ln1_b, wq, wk, wv, wproj, bproj,
     ln2_g, ln2_b, w1, b1, w2, b2) = params
    B, T, C = x.shape

    def ln(v, g, b):
        mu = jnp.mean(v, axis=-1, keepdims=True)
        var = jnp.mean((v - mu) ** 2, axis=-1, keepdims=True)
        return (v - mu) / jnp.sqrt(var + LN_EPS) * g + b

    h = ln(x, ln1_g, ln1_b)
    q = h @ wq
    k = h @ wk
    v = h @ wv
    qh = q.reshape(B, T, N_HEAD, HEAD_SIZE).transpose(0, 2, 1, 3)
    kh = k.reshape(B, T, N_HEAD, HEAD_SIZE).transpose(0, 2, 1, 3)
    vh = v.reshape(B, T, N_HEAD, HEAD_SIZE).transpose(0, 2, 1, 3)
    scores = jnp.einsum("bhqd,bhkd->bhqk", qh, kh) * HEAD_SIZE ** (-0.5)
    mask = jnp.tril(jnp.ones((T, T), bool))
    scores = jnp.where(mask, scores, -jnp.inf)
    probs = jax.nn.softmax(scores, axis=-1)
    out = jnp.einsum("bhqk,bhkd->bhqd", probs, vh)
    out = out.transpose(0, 2, 1, 3).reshape(B, T, C)
    x = x + (out @ wproj + bproj)
    h2 = ln(x, ln2_g, ln2_b)
    ff = jnp.maximum(h2 @ w1 + b1, 0.0) @ w2 + b2
    return x + ff


if __name__ == "__main__":
    key = jax.random.PRNGKey(0)
    k_x, k_p = jax.random.split(key)

    B, T, C = 2, BLOCK_SIZE, N_EMBD          # (2, 32, 64)
    x = jax.random.normal(k_x, (B, T, C), jnp.float32)
    params = init_params(k_p)

    out = transformer_block(x, params)
    out = jax.block_until_ready(out)

    ref = reference_block(x, params)
    assert out.shape == (B, T, C) and out.dtype == x.dtype
    assert jnp.allclose(out, ref, atol=1e-2, rtol=1e-2), "mismatch vs reference"

    print("KERNEL_OK")
</pallas_src>

<mosaic_0001>
module attributes {stable_mosaic.version = 11 : i64} {
  func.func @transformer_block_kernel(%arg0: i32, %arg1: memref<32x64xf32, #tpu.memory_space<vmem>>, %arg2: memref<32x32xf32, #tpu.memory_space<vmem>>, %arg3: memref<8x64xf32, #tpu.memory_space<vmem>>, %arg4: memref<1x256xf32, #tpu.memory_space<vmem>>, %arg5: memref<64x192xbf16, #tpu.memory_space<vmem>>, %arg6: memref<64x64xbf16, #tpu.memory_space<vmem>>, %arg7: memref<64x256xbf16, #tpu.memory_space<vmem>>, %arg8: memref<256x64xbf16, #tpu.memory_space<vmem>>, %arg9: memref<32x64xf32, #tpu.memory_space<vmem>>) attributes {dimension_semantics = [#tpu.dimension_semantics<parallel>], iteration_bounds = array<i64: 2>, scalar_prefetch = 0 : i64, scratch_operands = 0 : i64, tpu.core_type = #tpu.core_type<tc>, window_params = [{transform_indices = @transform_0, window_bounds = array<i64: 32, 64>}, {pipeline_mode = #tpu.pipeline_mode<synchronous>, transform_indices = @transform_1, window_bounds = array<i64: 32, 32>}, {pipeline_mode = #tpu.pipeline_mode<synchronous>, transform_indices = @transform_2, window_bounds = array<i64: 8, 64>}, {pipeline_mode = #tpu.pipeline_mode<synchronous>, transform_indices = @transform_3, window_bounds = array<i64: 1, 256>}, {pipeline_mode = #tpu.pipeline_mode<synchronous>, transform_indices = @transform_4, window_bounds = array<i64: 64, 192>}, {pipeline_mode = #tpu.pipeline_mode<synchronous>, transform_indices = @transform_5, window_bounds = array<i64: 64, 64>}, {pipeline_mode = #tpu.pipeline_mode<synchronous>, transform_indices = @transform_6, window_bounds = array<i64: 64, 256>}, {pipeline_mode = #tpu.pipeline_mode<synchronous>, transform_indices = @transform_7, window_bounds = array<i64: 256, 64>}, {transform_indices = @transform_8, window_bounds = array<i64: 32, 64>}]} {
    %c0 = arith.constant 0 : index
    %c0_0 = arith.constant 0 : index
    %0 = vector.load %arg1[%c0, %c0_0] : memref<32x64xf32, #tpu.memory_space<vmem>>, vector<32x64xf32>
    %c0_1 = arith.constant 0 : index
    %c0_2 = arith.constant 0 : index
    %1 = vector.load %arg3[%c0_1, %c0_2] : memref<8x64xf32, #tpu.memory_space<vmem>>, vector<8x64xf32>
    %2 = vector.extract_strided_slice %1 {offsets = [0, 0], sizes = [1, 64], strides = [1, 1]} : vector<8x64xf32> to vector<1x64xf32>
    %3 = vector.shape_cast %2 : vector<1x64xf32> to vector<64xf32>
    %4 = vector.extract_strided_slice %1 {offsets = [1, 0], sizes = [1, 64], strides = [1, 1]} : vector<8x64xf32> to vector<1x64xf32>
    %5 = vector.shape_cast %4 : vector<1x64xf32> to vector<64xf32>
    %6 = vector.extract_strided_slice %1 {offsets = [2, 0], sizes = [1, 64], strides = [1, 1]} : vector<8x64xf32> to vector<1x64xf32>
    %7 = vector.shape_cast %6 : vector<1x64xf32> to vector<64xf32>
    %8 = vector.extract_strided_slice %1 {offsets = [3, 0], sizes = [1, 64], strides = [1, 1]} : vector<8x64xf32> to vector<1x64xf32>
    %9 = vector.shape_cast %8 : vector<1x64xf32> to vector<64xf32>
    %10 = vector.extract_strided_slice %1 {offsets = [4, 0], sizes = [1, 64], strides = [1, 1]} : vector<8x64xf32> to vector<1x64xf32>
    %11 = vector.shape_cast %10 : vector<1x64xf32> to vector<64xf32>
    %12 = vector.extract_strided_slice %1 {offsets = [5, 0], sizes = [1, 64], strides = [1, 1]} : vector<8x64xf32> to vector<1x64xf32>
    %13 = vector.shape_cast %12 : vector<1x64xf32> to vector<64xf32>
    %c0_3 = arith.constant 0 : index
    %c0_4 = arith.constant 0 : index
    %14 = vector.load %arg4[%c0_3, %c0_4] : memref<1x256xf32, #tpu.memory_space<vmem>>, vector<1x256xf32>
    %15 = vector.shape_cast %14 : vector<1x256xf32> to vector<256xf32>
    %cst = arith.constant dense<0.000000e+00> : vector<32xf32>
    %16 = vector.multi_reduction <add>, %0, %cst [1] : vector<32x64xf32> to vector<32xf32>
    %17 = vector.shape_cast %16 : vector<32xf32> to vector<32x1xf32>
    %cst_5 = arith.constant 6.400000e+01 : f32
    %18 = vector.broadcast %cst_5 : f32 to vector<32x1xf32>
    %19 = arith.divf %17, %18 : vector<32x1xf32>
    %20 = vector.broadcast %19 : vector<32x1xf32> to vector<32x64xf32>
    %21 = arith.subf %0, %20 : vector<32x64xf32>
    %22 = arith.mulf %21, %21 : vector<32x64xf32>
    %cst_6 = arith.constant dense<0.000000e+00> : vector<32xf32>
    %23 = vector.multi_reduction <add>, %22, %cst_6 [1] : vector<32x64xf32> to vector<32xf32>
    %24 = vector.shape_cast %23 : vector<32xf32> to vector<32x1xf32>
    %cst_7 = arith.constant 6.400000e+01 : f32
    %25 = vector.broadcast %cst_7 : f32 to vector<32x1xf32>
    %26 = arith.divf %24, %25 : vector<32x1xf32>
    %27 = vector.broadcast %19 : vector<32x1xf32> to vector<32x64xf32>
    %28 = arith.subf %0, %27 : vector<32x64xf32>
    %cst_8 = arith.constant 9.99999974E-6 : f32
    %29 = vector.broadcast %cst_8 : f32 to vector<32x1xf32>
    %30 = arith.addf %26, %29 : vector<32x1xf32>
    %31 = math.rsqrt %30 : vector<32x1xf32>
    %32 = vector.broadcast %31 : vector<32x1xf32> to vector<32x64xf32>
    %33 = arith.mulf %28, %32 : vector<32x64xf32>
    %34 = vector.shape_cast %3 : vector<64xf32> to vector<1x64xf32>
    %35 = vector.broadcast %34 : vector<1x64xf32> to vector<32x64xf32>
    %36 = arith.mulf %33, %35 : vector<32x64xf32>
    %37 = vector.shape_cast %5 : vector<64xf32> to vector<1x64xf32>
    %38 = vector.broadcast %37 : vector<1x64xf32> to vector<32x64xf32>
    %39 = arith.addf %36, %38 : vector<32x64xf32>
    %40 = arith.truncf %39 : vector<32x64xf32> to vector<32x64xbf16>
    %c0_9 = arith.constant 0 : index
    %c0_10 = arith.constant 0 : index
    %41 = vector.load %arg5[%c0_9, %c0_10] : memref<64x192xbf16, #tpu.memory_space<vmem>>, vector<64x192xbf16>
    %cst_11 = arith.constant dense<0.000000e+00> : vector<32x192xf32>
    %42 = tpu.matmul %40, %41, %cst_11 {dimension_numbers = #tpu.dot_dimension_numbers<[1], [0], [0], [1], [0, 0, 1, 1], [], []>} : vector<32x64xbf16>, vector<64x192xbf16>, vector<32x192xf32> -> vector<32x192xf32>
    %43 = arith.truncf %42 : vector<32x192xf32> to vector<32x192xbf16>
    %c0_12 = arith.constant 0 : index
    %c0_13 = arith.constant 0 : index
    %44 = vector.load %arg2[%c0_12, %c0_13] : memref<32x32xf32, #tpu.memory_space<vmem>>, vector<32x32xf32>
    %45 = vector.extract_strided_slice %43 {offsets = [0, 0], sizes = [32, 16], strides = [1, 1]} : vector<32x192xbf16> to vector<32x16xbf16>
    %46 = vector.extract_strided_slice %43 {offsets = [0, 64], sizes = [32, 16], strides = [1, 1]} : vector<32x192xbf16> to vector<32x16xbf16>
    %47 = vector.extract_strided_slice %43 {offsets = [0, 128], sizes = [32, 16], strides = [1, 1]} : vector<32x192xbf16> to vector<32x16xbf16>
    %48 = tpu.transpose %46, [1, 0] : vector<32x16xbf16> -> vector<16x32xbf16>
    %cst_14 = arith.constant dense<0.000000e+00> : vector<32x32xf32>
    %49 = tpu.matmul %45, %48, %cst_14 {dimension_numbers = #tpu.dot_dimension_numbers<[1], [0], [0], [1], [0, 0, 1, 1], [], []>} : vector<32x16xbf16>, vector<16x32xbf16>, vector<32x32xf32> -> vector<32x32xf32>
    %cst_15 = arith.constant 2.500000e-01 : f32
    %50 = vector.broadcast %cst_15 : f32 to vector<32x32xf32>
    %51 = arith.mulf %49, %50 : vector<32x32xf32>
    %52 = arith.addf %51, %44 : vector<32x32xf32>
    %cst_16 = arith.constant dense<0xFF800000> : vector<32xf32>
    %53 = vector.multi_reduction <maximumf>, %52, %cst_16 [1] : vector<32x32xf32> to vector<32xf32>
    %54 = vector.shape_cast %53 : vector<32xf32> to vector<32x1xf32>
    %55 = vector.broadcast %54 : vector<32x1xf32> to vector<32x32xf32>
    %56 = arith.subf %52, %55 : vector<32x32xf32>
    %57 = math.exp %56 : vector<32x32xf32>
    %cst_17 = arith.constant dense<0.000000e+00> : vector<32xf32>
    %58 = vector.multi_reduction <add>, %57, %cst_17 [1] : vector<32x32xf32> to vector<32xf32>
    %59 = vector.shape_cast %58 : vector<32xf32> to vector<32x1xf32>
    %60 = arith.truncf %57 : vector<32x32xf32> to vector<32x32xbf16>
    %cst_18 = arith.constant dense<0.000000e+00> : vector<32x16xf32>
    %61 = tpu.matmul %60, %47, %cst_18 {dimension_numbers = #tpu.dot_dimension_numbers<[1], [0], [0], [1], [0, 0, 1, 1], [], []>} : vector<32x32xbf16>, vector<32x16xbf16>, vector<32x16xf32> -> vector<32x16xf32>
    %62 = tpu.reciprocal %59 {approx = true} : vector<32x1xf32> -> vector<32x1xf32>
    %63 = vector.broadcast %62 : vector<32x1xf32> to vector<32x16xf32>
    %64 = arith.mulf %61, %63 : vector<32x16xf32>
    %65 = vector.extract_strided_slice %43 {offsets = [0, 16], sizes = [32, 16], strides = [1, 1]} : vector<32x192xbf16> to vector<32x16xbf16>
    %66 = vector.extract_strided_slice %43 {offsets = [0, 80], sizes = [32, 16], strides = [1, 1]} : vector<32x192xbf16> to vector<32x16xbf16>
    %67 = vector.extract_strided_slice %43 {offsets = [0, 144], sizes = [32, 16], strides = [1, 1]} : vector<32x192xbf16> to vector<32x16xbf16>
    %68 = tpu.transpose %66, [1, 0] : vector<32x16xbf16> -> vector<16x32xbf16>
    %cst_19 = arith.constant dense<0.000000e+00> : vector<32x32xf32>
    %69 = tpu.matmul %65, %68, %cst_19 {dimension_numbers = #tpu.dot_dimension_numbers<[1], [0], [0], [1], [0, 0, 1, 1], [], []>} : vector<32x16xbf16>, vector<16x32xbf16>, vector<32x32xf32> -> vector<32x32xf32>
    %cst_20 = arith.constant 2.500000e-01 : f32
    %70 = vector.broadcast %cst_20 : f32 to vector<32x32xf32>
    %71 = arith.mulf %69, %70 : vector<32x32xf32>
    %72 = arith.addf %71, %44 : vector<32x32xf32>
    %cst_21 = arith.constant dense<0xFF800000> : vector<32xf32>
    %73 = vector.multi_reduction <maximumf>, %72, %cst_21 [1] : vector<32x32xf32> to vector<32xf32>
    %74 = vector.shape_cast %73 : vector<32xf32> to vector<32x1xf32>
    %75 = vector.broadcast %74 : vector<32x1xf32> to vector<32x32xf32>
    %76 = arith.subf %72, %75 : vector<32x32xf32>
    %77 = math.exp %76 : vector<32x32xf32>
    %cst_22 = arith.constant dense<0.000000e+00> : vector<32xf32>
    %78 = vector.multi_reduction <add>, %77, %cst_22 [1] : vector<32x32xf32> to vector<32xf32>
    %79 = vector.shape_cast %78 : vector<32xf32> to vector<32x1xf32>
    %80 = arith.truncf %77 : vector<32x32xf32> to vector<32x32xbf16>
    %cst_23 = arith.constant dense<0.000000e+00> : vector<32x16xf32>
    %81 = tpu.matmul %80, %67, %cst_23 {dimension_numbers = #tpu.dot_dimension_numbers<[1], [0], [0], [1], [0, 0, 1, 1], [], []>} : vector<32x32xbf16>, vector<32x16xbf16>, vector<32x16xf32> -> vector<32x16xf32>
    %82 = tpu.reciprocal %79 {approx = true} : vector<32x1xf32> -> vector<32x1xf32>
    %83 = vector.broadcast %82 : vector<32x1xf32> to vector<32x16xf32>
    %84 = arith.mulf %81, %83 : vector<32x16xf32>
    %85 = vector.extract_strided_slice %43 {offsets = [0, 32], sizes = [32, 16], strides = [1, 1]} : vector<32x192xbf16> to vector<32x16xbf16>
    %86 = vector.extract_strided_slice %43 {offsets = [0, 96], sizes = [32, 16], strides = [1, 1]} : vector<32x192xbf16> to vector<32x16xbf16>
    %87 = vector.extract_strided_slice %43 {offsets = [0, 160], sizes = [32, 16], strides = [1, 1]} : vector<32x192xbf16> to vector<32x16xbf16>
    %88 = tpu.transpose %86, [1, 0] : vector<32x16xbf16> -> vector<16x32xbf16>
    %cst_24 = arith.constant dense<0.000000e+00> : vector<32x32xf32>
    %89 = tpu.matmul %85, %88, %cst_24 {dimension_numbers = #tpu.dot_dimension_numbers<[1], [0], [0], [1], [0, 0, 1, 1], [], []>} : vector<32x16xbf16>, vector<16x32xbf16>, vector<32x32xf32> -> vector<32x32xf32>
    %cst_25 = arith.constant 2.500000e-01 : f32
    %90 = vector.broadcast %cst_25 : f32 to vector<32x32xf32>
    %91 = arith.mulf %89, %90 : vector<32x32xf32>
    %92 = arith.addf %91, %44 : vector<32x32xf32>
    %cst_26 = arith.constant dense<0xFF800000> : vector<32xf32>
    %93 = vector.multi_reduction <maximumf>, %92, %cst_26 [1] : vector<32x32xf32> to vector<32xf32>
    %94 = vector.shape_cast %93 : vector<32xf32> to vector<32x1xf32>
    %95 = vector.broadcast %94 : vector<32x1xf32> to vector<32x32xf32>
    %96 = arith.subf %92, %95 : vector<32x32xf32>
    %97 = math.exp %96 : vector<32x32xf32>
    %cst_27 = arith.constant dense<0.000000e+00> : vector<32xf32>
    %98 = vector.multi_reduction <add>, %97, %cst_27 [1] : vector<32x32xf32> to vector<32xf32>
    %99 = vector.shape_cast %98 : vector<32xf32> to vector<32x1xf32>
    %100 = arith.truncf %97 : vector<32x32xf32> to vector<32x32xbf16>
    %cst_28 = arith.constant dense<0.000000e+00> : vector<32x16xf32>
    %101 = tpu.matmul %100, %87, %cst_28 {dimension_numbers = #tpu.dot_dimension_numbers<[1], [0], [0], [1], [0, 0, 1, 1], [], []>} : vector<32x32xbf16>, vector<32x16xbf16>, vector<32x16xf32> -> vector<32x16xf32>
    %102 = tpu.reciprocal %99 {approx = true} : vector<32x1xf32> -> vector<32x1xf32>
    %103 = vector.broadcast %102 : vector<32x1xf32> to vector<32x16xf32>
    %104 = arith.mulf %101, %103 : vector<32x16xf32>
    %105 = vector.extract_strided_slice %43 {offsets = [0, 48], sizes = [32, 16], strides = [1, 1]} : vector<32x192xbf16> to vector<32x16xbf16>
    %106 = vector.extract_strided_slice %43 {offsets = [0, 112], sizes = [32, 16], strides = [1, 1]} : vector<32x192xbf16> to vector<32x16xbf16>
    %107 = vector.extract_strided_slice %43 {offsets = [0, 176], sizes = [32, 16], strides = [1, 1]} : vector<32x192xbf16> to vector<32x16xbf16>
    %108 = tpu.transpose %106, [1, 0] : vector<32x16xbf16> -> vector<16x32xbf16>
    %cst_29 = arith.constant dense<0.000000e+00> : vector<32x32xf32>
    %109 = tpu.matmul %105, %108, %cst_29 {dimension_numbers = #tpu.dot_dimension_numbers<[1], [0], [0], [1], [0, 0, 1, 1], [], []>} : vector<32x16xbf16>, vector<16x32xbf16>, vector<32x32xf32> -> vector<32x32xf32>
    %cst_30 = arith.constant 2.500000e-01 : f32
    %110 = vector.broadcast %cst_30 : f32 to vector<32x32xf32>
    %111 = arith.mulf %109, %110 : vector<32x32xf32>
    %112 = arith.addf %111, %44 : vector<32x32xf32>
    %cst_31 = arith.constant dense<0xFF800000> : vector<32xf32>
    %113 = vector.multi_reduction <maximumf>, %112, %cst_31 [1] : vector<32x32xf32> to vector<32xf32>
    %114 = vector.shape_cast %113 : vector<32xf32> to vector<32x1xf32>
    %115 = vector.broadcast %114 : vector<32x1xf32> to vector<32x32xf32>
    %116 = arith.subf %112, %115 : vector<32x32xf32>
    %117 = math.exp %116 : vector<32x32xf32>
    %cst_32 = arith.constant dense<0.000000e+00> : vector<32xf32>
    %118 = vector.multi_reduction <add>, %117, %cst_32 [1] : vector<32x32xf32> to vector<32xf32>
    %119 = vector.shape_cast %118 : vector<32xf32> to vector<32x1xf32>
    %120 = arith.truncf %117 : vector<32x32xf32> to vector<32x32xbf16>
    %cst_33 = arith.constant dense<0.000000e+00> : vector<32x16xf32>
    %121 = tpu.matmul %120, %107, %cst_33 {dimension_numbers = #tpu.dot_dimension_numbers<[1], [0], [0], [1], [0, 0, 1, 1], [], []>} : vector<32x32xbf16>, vector<32x16xbf16>, vector<32x16xf32> -> vector<32x16xf32>
    %122 = tpu.reciprocal %119 {approx = true} : vector<32x1xf32> -> vector<32x1xf32>
    %123 = vector.broadcast %122 : vector<32x1xf32> to vector<32x16xf32>
    %124 = arith.mulf %121, %123 : vector<32x16xf32>
    %125 = tpu.concatenate %64, %84, %104, %124 in 1 : vector<32x16xf32>, vector<32x16xf32>, vector<32x16xf32>, vector<32x16xf32> -> vector<32x64xf32>
    %126 = arith.truncf %125 : vector<32x64xf32> to vector<32x64xbf16>
    %c0_34 = arith.constant 0 : index
    %c0_35 = arith.constant 0 : index
    %127 = vector.load %arg6[%c0_34, %c0_35] : memref<64x64xbf16, #tpu.memory_space<vmem>>, vector<64x64xbf16>
    %cst_36 = arith.constant dense<0.000000e+00> : vector<32x64xf32>
    %128 = tpu.matmul %126, %127, %cst_36 {dimension_numbers = #tpu.dot_dimension_numbers<[1], [0], [0], [1], [0, 0, 1, 1], [], []>} : vector<32x64xbf16>, vector<64x64xbf16>, vector<32x64xf32> -> vector<32x64xf32>
    %129 = vector.shape_cast %7 : vector<64xf32> to vector<1x64xf32>
    %130 = vector.broadcast %129 : vector<1x64xf32> to vector<32x64xf32>
    %131 = arith.addf %128, %130 : vector<32x64xf32>
    %132 = arith.addf %0, %131 : vector<32x64xf32>
    %cst_37 = arith.constant dense<0.000000e+00> : vector<32xf32>
    %133 = vector.multi_reduction <add>, %132, %cst_37 [1] : vector<32x64xf32> to vector<32xf32>
    %134 = vector.shape_cast %133 : vector<32xf32> to vector<32x1xf32>
    %cst_38 = arith.constant 6.400000e+01 : f32
    %135 = vector.broadcast %cst_38 : f32 to vector<32x1xf32>
    %136 = arith.divf %134, %135 : vector<32x1xf32>
    %137 = vector.broadcast %136 : vector<32x1xf32> to vector<32x64xf32>
    %138 = arith.subf %132, %137 : vector<32x64xf32>
    %139 = arith.mulf %138, %138 : vector<32x64xf32>
    %cst_39 = arith.constant dense<0.000000e+00> : vector<32xf32>
    %140 = vector.multi_reduction <add>, %139, %cst_39 [1] : vector<32x64xf32> to vector<32xf32>
    %141 = vector.shape_cast %140 : vector<32xf32> to vector<32x1xf32>
    %cst_40 = arith.constant 6.400000e+01 : f32
    %142 = vector.broadcast %cst_40 : f32 to vector<32x1xf32>
    %143 = arith.divf %141, %142 : vector<32x1xf32>
    %144 = vector.broadcast %136 : vector<32x1xf32> to vector<32x64xf32>
    %145 = arith.subf %132, %144 : vector<32x64xf32>
    %cst_41 = arith.constant 9.99999974E-6 : f32
    %146 = vector.broadcast %cst_41 : f32 to vector<32x1xf32>
    %147 = arith.addf %143, %146 : vector<32x1xf32>
    %148 = math.rsqrt %147 : vector<32x1xf32>
    %149 = vector.broadcast %148 : vector<32x1xf32> to vector<32x64xf32>
    %150 = arith.mulf %145, %149 : vector<32x64xf32>
    %151 = vector.shape_cast %9 : vector<64xf32> to vector<1x64xf32>
    %152 = vector.broadcast %151 : vector<1x64xf32> to vector<32x64xf32>
    %153 = arith.mulf %150, %152 : vector<32x64xf32>
    %154 = vector.shape_cast %11 : vector<64xf32> to vector<1x64xf32>
    %155 = vector.broadcast %154 : vector<1x64xf32> to vector<32x64xf32>
    %156 = arith.addf %153, %155 : vector<32x64xf32>
    %157 = arith.truncf %156 : vector<32x64xf32> to vector<32x64xbf16>
    %c0_42 = arith.constant 0 : index
    %c0_43 = arith.constant 0 : index
    %158 = vector.load %arg7[%c0_42, %c0_43] : memref<64x256xbf16, #tpu.memory_space<vmem>>, vector<64x256xbf16>
    %cst_44 = arith.constant dense<0.000000e+00> : vector<32x256xf32>
    %159 = tpu.matmul %157, %158, %cst_44 {dimension_numbers = #tpu.dot_dimension_numbers<[1], [0], [0], [1], [0, 0, 1, 1], [], []>} : vector<32x64xbf16>, vector<64x256xbf16>, vector<32x256xf32> -> vector<32x256xf32>
    %160 = vector.shape_cast %15 : vector<256xf32> to vector<1x256xf32>
    %161 = vector.broadcast %160 : vector<1x256xf32> to vector<32x256xf32>
    %162 = arith.addf %159, %161 : vector<32x256xf32>
    %cst_45 = arith.constant 0.000000e+00 : f32
    %163 = vector.broadcast %cst_45 : f32 to vector<32x256xf32>
    %164 = arith.maximumf %162, %163 : vector<32x256xf32>
    %165 = arith.truncf %164 : vector<32x256xf32> to vector<32x256xbf16>
    %c0_46 = arith.constant 0 : index
    %c0_47 = arith.constant 0 : index
    %166 = vector.load %arg8[%c0_46, %c0_47] : memref<256x64xbf16, #tpu.memory_space<vmem>>, vector<256x64xbf16>
    %cst_48 = arith.constant dense<0.000000e+00> : vector<32x64xf32>
    %167 = tpu.matmul %165, %166, %cst_48 {dimension_numbers = #tpu.dot_dimension_numbers<[1], [0], [0], [1], [0, 0, 1, 1], [], []>} : vector<32x256xbf16>, vector<256x64xbf16>, vector<32x64xf32> -> vector<32x64xf32>
    %168 = vector.shape_cast %13 : vector<64xf32> to vector<1x64xf32>
    %169 = vector.broadcast %168 : vector<1x64xf32> to vector<32x64xf32>
    %170 = arith.addf %167, %169 : vector<32x64xf32>
    %171 = arith.addf %132, %170 : vector<32x64xf32>
    %c0_49 = arith.constant 0 : index
    %c0_50 = arith.constant 0 : index
    %172 = vector.load %arg9[%c0_49, %c0_50] : memref<32x64xf32, #tpu.memory_space<vmem>>, vector<32x64xf32>
    tpu.vector_store %arg9[%c0_49, %c0_50], %171 {strides = array<i32>} : memref<32x64xf32, #tpu.memory_space<vmem>>, vector<32x64xf32>,
    return
  }
  func.func @transform_0(%arg0: i32) -> (i32, i32) {
    %c0_i32 = arith.constant 0 : i32
    %c0_i32_0 = arith.constant 0 : i32
    return %arg0, %c0_i32 : i32, i32
  }
  func.func @transform_1(%arg0: i32) -> (i32, i32) {
    %c0_i32 = arith.constant 0 : i32
    %c0_i32_0 = arith.constant 0 : i32
    %c0_i32_1 = arith.constant 0 : i32
    return %c0_i32, %c0_i32_0 : i32, i32
  }
  func.func @transform_2(%arg0: i32) -> (i32, i32) {
    %c0_i32 = arith.constant 0 : i32
    %c0_i32_0 = arith.constant 0 : i32
    %c0_i32_1 = arith.constant 0 : i32
    return %c0_i32, %c0_i32_0 : i32, i32
  }
  func.func @transform_3(%arg0: i32) -> (i32, i32) {
    %c0_i32 = arith.constant 0 : i32
    %c0_i32_0 = arith.constant 0 : i32
    %c0_i32_1 = arith.constant 0 : i32
    return %c0_i32, %c0_i32_0 : i32, i32
  }
  func.func @transform_4(%arg0: i32) -> (i32, i32) {
    %c0_i32 = arith.constant 0 : i32
    %c0_i32_0 = arith.constant 0 : i32
    %c0_i32_1 = arith.constant 0 : i32
    return %c0_i32, %c0_i32_0 : i32, i32
  }
  func.func @transform_5(%arg0: i32) -> (i32, i32) {
    %c0_i32 = arith.constant 0 : i32
    %c0_i32_0 = arith.constant 0 : i32
    %c0_i32_1 = arith.constant 0 : i32
    return %c0_i32, %c0_i32_0 : i32, i32
  }
  func.func @transform_6(%arg0: i32) -> (i32, i32) {
    %c0_i32 = arith.constant 0 : i32
    %c0_i32_0 = arith.constant 0 : i32
    %c0_i32_1 = arith.constant 0 : i32
    return %c0_i32, %c0_i32_0 : i32, i32
  }
  func.func @transform_7(%arg0: i32) -> (i32, i32) {
    %c0_i32 = arith.constant 0 : i32
    %c0_i32_0 = arith.constant 0 : i32
    %c0_i32_1 = arith.constant 0 : i32
    return %c0_i32, %c0_i32_0 : i32, i32
  }
  func.func @transform_8(%arg0: i32) -> (i32, i32) {
    %c0_i32 = arith.constant 0 : i32
    %c0_i32_0 = arith.constant 0 : i32
    return %arg0, %c0_i32 : i32, i32
  }
}

</mosaic_0001>

<bundles_post_ra>
// kernel: tpu_custom_call.1
= control target key start
LH: loop header
LB: loop body
LE: loop exit
PB: predicated region body
PF: predicated region fallthrough
CT: control target
= control target key end

     0   :  { %13 = vsyncpa [#allocation3], 0  ;;  %s3245_s0 = inlined_call_operand.vmem [shape: f32[64,64], index: 0, kind: input, shape index: {}]   ;;  %s3246_s1 = inlined_call_operand.hbm [shape: f32[32,32], index: 1, kind: input, shape index: {}]   ;;  %s3247_s2 = inlined_call_operand.hbm [shape: f32[8,64], index: 2, kind: input, shape index: {}]   ;;  %s3248_s3 = inlined_call_operand.vmem [shape: f32[1,256], index: 3, kind: input, shape index: {}]   ;;  %s3249_s4 = inlined_call_operand.vmem [shape: bf16[64,192], index: 4, kind: input, shape index: {}]   ;;  %s3250_s5 = inlined_call_operand.hbm [shape: bf16[64,64], index: 5, kind: input, shape index: {}]   ;;  %s3251_s6 = inlined_call_operand.vmem [shape: bf16[64,256], index: 6, kind: input, shape index: {}]   ;;  %s3252_s7 = inlined_call_operand.vmem [shape: bf16[256,64], index: 7, kind: input, shape index: {}]   ;;  %s3253_s8 = inlined_call_operand.hbm [shape: f32[64,64], index: 8, kind: output, shape index: {}]  }
   0x1   :  { %14 = vsyncpa [#allocation6], 0 }
   0x2   :  { %15 = vsyncpa [#allocation4], 0 }
   0x3   :  { %17 = vsyncpa [#allocation4 + $0x1], 0  ;;  %s2610_s27 = smov 0   ;;  %s2612_s28 = smov 0  }
   0x4   :  { %s2614_s29 = smov 0   ;;  %s2616_s30 = smov 0  }
   0x5 LB: > { %s2631_s9 = sadd.s32 4294967295, %s2545_s30   ;;  %s1929_s10 = sadd.s32 4294967294, %s2545_s30   ;;  %s2545_s30 = sphi %s2616_s30, %s3271_s30   ;;  %s2541_s29 = sphi %s2614_s29, %s3270_s29   ;;  %s2537_s28 = sphi %s2612_s28, %s3269_s28   ;;  %s2533_s27 = sphi %s2610_s27, %s3268_s27  }
   0x6   : > { %s2635_s11 = sadd.s32 1, %s2545_s30   ;;  %s203_s12 = sadd.s32 1, %s2541_s29 }
   0x7   : > { %s200_s13 = ssub.s32 %s2545_s30, %s2635_s11  ;;  %p213_p0 = scmp.ne.s32.totalorder %s2541_s29, %s2537_s28 }
   0x8   : > { %p201_p1 = scmp.eq.s32.totalorder %s200_s13, 0  ;;  %p214_p2 = scmp.eq.s32.totalorder %s2631_s9, 1 }
   0x9   : > { %p219_p3 = scmp.ne.s32.totalorder %s2537_s28, %s2533_s27  ;;  %p220_p4 = scmp.eq.s32.totalorder %s1929_s10, 1 }
   0xa   : > { %s2646_s14 = scalar_select %p201_p1, %s2541_s29, %s203_s12  }
   0xb   : > { %p2648_p5 = por %p214_p2, %p213_p0  ;;  %p2652_p6 = por %p220_p4, %p219_p3 }
   0xc   : > { %p1930_p7 = scmp.ge.s32.totalorder %s2545_s30, 1  ;;  %p227_p8 = scmp.lt.s32.totalorder %s2545_s30, 3 }
   0xd   : > { %s3257_s15 = scalar_select %p2648_p5, 1, 0 }
   0xe   : > { %s3258_s16 = scalar_select %p2652_p6, 1, 0 }
   0xf   : > { %p3254_p9 = scmp.eq.s32.totalorder %s2631_s9, 0  ;;  %p2659_p10 = pnand %p1930_p7, %p227_p8 }
  0x10   : > { %s2547_s18 = smov [#allocation5]   ;;  %s2548_s20 = smov [#allocation2]  }
  0x11   : > { %s3259_s17 = scalar_select %p2659_p10, 1, 0 }
  0x12   : > { %s253_s19 = sshll.u32 %s2547_s18, 4  ;;  %p2170_p11 = pneg %p2659_p10  ;;  %s254_s19 = int_to_ptr.vmem [resolvable:$true] %s253_s19 }
  0x13   : > { %s239_s21 = sshll.u32 %s2548_s20, 4  ;;  %s2549_s23 = smov [#allocation7]   ;;  %s240_s21 = int_to_ptr.vmem [resolvable:$true] %s239_s21 }
  0x14   : > { %p2667_p12 = pnand %p3254_p9, %p2170_p11  ;;  %s269_s24 = sshll.u32 %s2549_s23, 4  ;;  %s270_s24 = int_to_ptr.vmem [resolvable:$true] %s269_s24 }
  0x15   : > { %s2410_s25 = scalar_lea.vmem %s254_s19, 128  ;;  %p2418_p3 = scmp.lt.s32.totalorder %s254_s19, %s254_s19 }
  0x16   : > { %p2401_p13 = pneg %p2667_p12  ;;  %p2411_p0 = scmp.ne.s32.totalorder %s254_s19, %s2410_s25 }
  0x17   : > { %p2419_p4 = scmp.lt.s32.totalorder %s2410_s25, %s2410_s25 }
  0x18   : > { %p2413_p1 = pnand %p2411_p0, %p2401_p13 }
  0x19   : > { %p2420_p7 = por %p2419_p4, %p2418_p3 }
  0x1a   : > { %p2414_p2 = pneg %p2413_p1 }
  0x1c   : > { %p2421_p8 = pnand %p2420_p7, %p2414_p2 }
  0x1e   : > { %2424 = shalt.err (!%p2421_p8)
}
  0x1f   : > { %2176 = dma.hbm_to_vmem [thread:$0]  (!%p2667_p12), %s3247_s2, 128, %s254_s19, [#allocation6]  }
  0x20   : > { %s2436_s12 = scalar_lea.vmem %s240_s21, 512  ;;  %p2444_p0 = scmp.lt.s32.totalorder %s240_s21, %s240_s21 }
  0x21   : > { %p2437_p11 = scmp.ne.s32.totalorder %s240_s21, %s2436_s12  ;;  %p2445_p1 = scmp.lt.s32.totalorder %s2436_s12, %s2436_s12 }
  0x23   : > { %p2439_p9 = pnand %p2437_p11, %p2401_p13  ;;  %p2446_p5 = por %p2445_p1, %p2444_p0 }
  0x25   : > { %p2440_p6 = pneg %p2439_p9 }
  0x27   : > { %p2447_p10 = pnand %p2446_p5, %p2440_p6 }
  0x29   : > { %2450 = shalt.err (!%p2447_p10)
}
  0x2a   : > { %s2550_s13 = smov 128   ;;  %s2551_s18 = smov 8  }
  0x2b   : > { %2173 = dma.hbm_to_vmem [thread:$0]  (!%p2667_p12), %s3246_s1, 512, %s240_s21, [#allocation3], %s2550_s13, %s2550_s13, %s2551_s18  }
  0x2c   : > { %s2462_s19 = scalar_lea.vmem %s270_s24, 512  ;;  %p2470_p4 = scmp.lt.s32.totalorder %s270_s24, %s270_s24 }
  0x2d   : > { %p2463_p2 = scmp.ne.s32.totalorder %s270_s24, %s2462_s19  ;;  %p2471_p7 = scmp.lt.s32.totalorder %s2462_s19, %s2462_s19 }
  0x2f   : > { %p2465_p9 = pnand %p2463_p2, %p2401_p13  ;;  %p2472_p5 = por %p2471_p7, %p2470_p4 }
  0x31   : > { %p2466_p3 = pneg %p2465_p9 }
  0x33   : > { %p2473_p6 = pnand %p2472_p5, %p2466_p3 }
  0x35   : > { %2476 = shalt.err (!%p2473_p6)
}
  0x36   : > { %s2552_s25 = smov 64   ;;  %s2553_s26 = smov 4  }
  0x37   : > { %2179 = dma.hbm_to_vmem [thread:$0]  (!%p2667_p12), %s3250_s5, 512, %s270_s24, [#allocation6], %s2552_s25, %s2552_s25, %s2553_s26  }
  0x38   : > { %p3261_p10 = scmp.ne.s32.totalorder %s3259_s17, 0 }
  0x39   : > { %p3262_p8 = scmp.eq.s32.totalorder (!%p3261_p10), %s2631_s9, 0 }
  0x3a   : > { %300 = sbr.rel (%p3261_p10) target bundleno = 2806 (0xaf6), region = 52 }
  0x3f   : > { %2520 = dma.done.wait (%p3262_p8), [#allocation3], 512   ;;  %p3263_p13 = pmov %p3262_p8 }
  0x40   : > { %p3264_p11 = pmov %p3262_p8 }
  0x41   : > { %2522 = vsyncadd (%p3263_p13), [#allocation3], 4294966784 }
  0x42   : > { %2524 = dma.done.wait (%p3264_p11), [#allocation6], 640   ;;  %p3265_p0 = pmov %p3262_p8 }
  0x43   : > { %s1940_s21 = sshll.u32 %s2631_s9, 2  ;;  %vm356_vm0 = vcmask 523264   ;;  %v2270_v28 = vld [vmem:[%s3249_s4 + $0x34] ss:$8 sps:$4 sm:$0xff]   ;;  %v2272_v29 = vld [vmem:[%s3249_s4 + $0x30] ss:$8 sps:$4 sm:$0xff]   ;;  %v410_v46 = vlaneseq }
  0x44   : > { %2526 = vsyncadd (%p3265_p0), [#allocation6], 4294966656  ;;  %p343_p1 = scmp.lt.s32.totalorder %s1940_s21, 7  ;;  %v2273_v30 = vld [vmem:[%s3249_s4 + $0x24] ss:$8 sps:$4 sm:$0xff]   ;;  %490 = vmatprep.subr.bf16.mxu1 %v2270_v28  ;;  %v2554_v32 = vmov 0  }
  0x45   : > { %491 = vmatpush1.bf16.msra.mxu1 %v2272_v29  ;;  %v2275_v31 = vld [vmem:[%s3249_s4 + $0x20] ss:$8 sps:$4 sm:$0xff]   ;;  %514 = vmatprep.mubr.bf16.mxu1 %v2554_v32  ;;  %v2276_v33 = vld [vmem:[%s3249_s4 + $0x14] ss:$8 sps:$4 sm:$0xff]   ;;  %v2278_v34 = vld [vmem:[%s3249_s4 + $0x10] ss:$8 sps:$4 sm:$0xff]  }
  0x46   : > { %s3273_s21 = smov (!%p343_p1, %s1940_s21), 7  ;;  %492 = vmatprep.subr.bf16.mxu1 %v2273_v30  ;;  %v2279_v35 = vld [vmem:[%s3249_s4 + $0x4] ss:$8 sps:$4 sm:$0xff]   ;;  %v2281_v36 = vld [vmem:[%s3249_s4] ss:$8 sps:$4 sm:$0xff]   ;;  %v2758_v50 = vshrl.u32 %v410_v46, 7 }
  0x47   : > { %s1941_s22 = sshll.u32 %s3273_s21, 3  ;;  %v2761_v52 = vld [vmem:[#allocation5] sm:$0xff]  ;;  %vm549_vm1 = vcmask 130048   ;;  %s2555_s25 = smov 48   ;;  %vm619_vm2 = vcmask 261120   ;;  %vm1331_vm3 = vcmask 392192  }
  0x48   : > { %s2711_s13 = scalar_lea.vmem %s3245_s0, %s1941_s22  ;;  %v412_v51 = vsub.s32 0, %v2758_v50  ;;  %v420_v56 = vsub.s32 1, %v2758_v50  ;;  %s2556_s26 = smov 64  }
  0x49   : > { %v350_v0 = vld [vmem:[%s2711_s13] sm:$0xff]  ;;  %v352_v1 = vld [vmem:[%s2711_s13 + $0x10] sm:$0xff]  ;;  %v351_v2 = vld [vmem:[%s2711_s13 + $0x8] sm:$0xff]  ;;  %493 = vmatpush1.bf16.msra.mxu1 %v2275_v31  ;;  %s2557_s10 = smov 112   ;;  %s2558_s12 = smov 32  }
  0x4a   : > { %v357_v3 = vsel %vm356_vm0, %v350_v0, 0.0  ;;  %v363_v4 = vsel %vm356_vm0, %v352_v1, 0.0  ;;  %v353_v5 = vld [vmem:[%s2711_s13 + $0x18] sm:$0xff]  ;;  %v360_v6 = vsel %vm356_vm0, %v351_v2, 0.0  ;;  %494 = vmatprep.subr.bf16.mxu1 %v2276_v33  ;;  %v413_v55 = vrot.slane %v2761_v52, %v412_v51  ;;  %s2559_s21 = smov 96   ;;  %s2560_s22 = smov 16  }
  0x4b   : > { %358 = vadd.xlane.f32.xlu0 %v357_v3  ;;  %364 = vadd.xlane.f32.xlu1 %v363_v4  ;;  %v366_v7 = vsel %vm356_vm0, %v353_v5, 0.0  ;;  %v421_v60 = vrot.slane %v2761_v52, %v420_v56  ;;  %s2561_s17 = smov 80   ;;  %s2005_s24 = sshll.u32 %s2631_s9, 9 }
  0x4c   : > { %s3197_s19 = scalar_lea.hbm %s3253_s8, %s2005_s24  ;;  %p3266_p2 = scmp.ne.s32.totalorder %s3257_s15, 0 }
  0x4d   : > { %495 = vmatpush1.bf16.msra.mxu1 %v2278_v34 }
  0x4e   : > { %496 = vmatprep.subr.bf16.mxu1 %v2279_v35 }
  0x4f   : > { %361 = vadd.xlane.f32.xlu0 %v360_v6  ;;  %367 = vadd.xlane.f32.xlu1 %v366_v7 }
  0x51   : > { %497 = vmatpush1.bf16.msra.mxu1 %v2281_v36 }
  0xd4   : > { %v359_v8 = vpop.xlane.xlu0 %358  ;;  %v365_v9 = vpop.xlane.xlu1 %364 }
  0xd5   : > { %v370_v10 = vmul.f32 0.015625, %v359_v8  ;;  %v372_v11 = vmul.f32 0.015625, %v365_v9 }
  0xd7   : > { %v374_v12 = vsub.f32 %v350_v0, %v370_v10  ;;  %v2721_v13 = vsub.f32 %v352_v1, %v372_v11 }
  0xd8   : > { %v362_v14 = vpop.xlane.xlu0 %361  ;;  %v368_v15 = vpop.xlane.xlu1 %367 }
  0xd9   : > { %v371_v16 = vmul.f32 0.015625, %v362_v14  ;;  %v373_v17 = vmul.f32 0.015625, %v368_v15  ;;  %v378_v18 = vmul.f32 %v374_v12, %v374_v12  ;;  %v380_v19 = vmul.f32 %v2721_v13, %v2721_v13 }
  0xdb   : > { %v375_v20 = vsub.f32 %v351_v2, %v371_v16  ;;  %v2725_v21 = vsub.f32 %v353_v5, %v373_v17  ;;  %v382_v22 = vsel %vm356_vm0, %v378_v18, 0.0  ;;  %v388_v23 = vsel %vm356_vm0, %v380_v19, 0.0 }
  0xdc   : > { %383 = vadd.xlane.f32.xlu0 %v382_v22 }
  0xdd   : > { %v379_v24 = vmul.f32 %v375_v20, %v375_v20  ;;  %v381_v25 = vmul.f32 %v2725_v21, %v2725_v21 }
  0xdf   : > { %v385_v26 = vsel %vm356_vm0, %v379_v24, 0.0  ;;  %v391_v27 = vsel %vm356_vm0, %v381_v25, 0.0 }
  0xe0   : > { %389 = vadd.xlane.f32.xlu0 %v388_v23  ;;  %386 = vadd.xlane.f32.xlu1 %v385_v26 }
  0xe4   : > { %392 = vadd.xlane.f32.xlu1 %v391_v27 }
 0x165   : > { %v384_v37 = vpop.xlane.xlu0 %383 }
 0x166   : > { %v394_v38 = vmul.f32 0.015625, %v384_v37 }
 0x168   : > { %v398_v39 = vadd.f32 1e-05, %v394_v38 }
 0x169   : > { %v387_v40 = vpop.xlane.xlu1 %386  ;;  %v390_v41 = vpop.xlane.xlu0 %389 }
 0x16a   : > { %2314 = vrsqrt.f32 %v398_v39  ;;  %v395_v42 = vmul.f32 0.015625, %v387_v40  ;;  %v396_v43 = vmul.f32 0.015625, %v390_v41  ;;  %v2825_v41 = vld [vmem:[#allocation2 + $0x10] sm:$0xff] }
 0x16c   : > { %v399_v44 = vadd.f32 1e-05, %v395_v42  ;;  %v400_v45 = vadd.f32 1e-05, %v396_v43 }
 0x16d   : > { %v393_v47 = vpop.xlane.xlu1 %392 }
 0x16e   : > { %2316 = vrsqrt.f32 %v399_v44  ;;  %v397_v48 = vmul.f32 0.015625, %v393_v47 }
 0x16f   : > { %2318 = vrsqrt.f32 %v400_v45 }
 0x170   : > { %v401_v49 = vadd.f32 1e-05, %v397_v48 }
 0x172   : > { %2320 = vrsqrt.f32 %v401_v49  ;;  %v2830_v49 = vld [vmem:[#allocation2 + $0x18] sm:$0xff] }
 0x177   : > { %v2315_v53 = vpop.eup %2314 }
 0x178   : > { %v406_v54 = vmul.f32 %v2315_v53, %v374_v12 }
 0x17a   : > { %v414_v59 = vmul.f32 %v413_v55, %v406_v54 }
 0x17b   : > { %v2317_v57 = vpop.eup %2316 }
 0x17c   : > { %v407_v58 = vmul.f32 %v2317_v57, %v375_v20  ;;  %v2319_v61 = vpop.eup %2318  ;;  %v422_v0 = vadd.f32 %v421_v60, %v414_v59 }
 0x17d   : > { %v408_v2 = vmul.f32 %v2319_v61, %v2721_v13  ;;  %v2839_v61 = vld [vmem:[#allocation2 + $0x8] sm:$0xff] }
 0x17e   : > { %v415_v62 = vmul.f32 %v413_v55, %v407_v58 }
 0x17f   : > { %v2321_v63 = vpop.eup %2320  ;;  %v416_v6 = vmul.f32 %v413_v55, %v408_v2 }
 0x180   : > { %v423_v1 = vadd.f32 %v421_v60, %v415_v62  ;;  %v409_v3 = vmul.f32 %v2321_v63, %v2725_v21 }
 0x181   : > { %v424_v8 = vadd.f32 %v421_v60, %v416_v6 }
 0x182   : > { %v426_v4 = vpack.c.bf16 %v423_v1, %v422_v0  ;;  %v417_v5 = vmul.f32 %v413_v55, %v409_v3 }
 0x184   : > { %1950 = vmatmul.mubr.msk.bf16.vlgmr.msra.gmra.mxu1 %vm356_vm0, %v426_v4  ;;  %v425_v7 = vadd.f32 %v421_v60, %v417_v5  ;;  %v2837_v60 = vld [vmem:[#allocation2] sm:$0xff] }
 0x185   : > { %524 = vmatprep.mubr.bf16.mxu1 %v2554_v32 }
 0x186   : > { %v427_v9 = vpack.c.bf16 %v425_v7, %v424_v8 }
 0x18c   : > { %1951 = vmatmul.mubr.msk.bf16.gmra.mxu1 %vm356_vm0, %v427_v9 }
 0x244   : > { %v516_v10 = vpop.f32.mrf.mxu1 }
 0x246   : > { %v518_v11 = vpop.f32.mrf.mxu1 }
 0x248   : > { %v520_v12 = vpop.f32.mrf.mxu1 }
 0x249   : > { %v2775_v14 = vpack.c.bf16 %v520_v12, %v516_v10 }
 0x24a   : > { %v522_v13 = vpop.f32.mrf.mxu1 }
 0x24b   : > { %v2777_v15 = vpack.c.bf16 %v522_v13, %v518_v11  ;;  %2076 = vmatprep.mubr.msk.bf16.mxu1 %vm549_vm1, %v2775_v14 }
 0x24c   : > { %v526_v16 = vpop.f32.mrf.mxu1 }
 0x24e   : > { %v528_v17 = vpop.f32.mrf.mxu1 }
 0x250   : > { %v530_v18 = vpop.f32.mrf.mxu1 }
 0x251   : > { %v2781_v19 = vpack.c.bf16 %v530_v18, %v526_v16 }
 0x252   : > { %v532_v26 = vpop.f32.mrf.mxu1 }
 0x253   : > { %727 = vrot.lane.b32.xlu1 %v2781_v19, %s2555_s25  ;;  %547 = vrot.lane.b32.xlu0 %v2781_v19, %s2556_s26  ;;  %v2807_v28 = vpack.c.bf16 %v532_v26, %v528_v17 }
 0x257   : > { %545 = vrot.lane.b32.xlu1 %v2775_v14, %s2556_s26  ;;  %721 = vrot.lane.b32.xlu0 %v2775_v14, %s2557_s10  ;;  %s2562_s26 = smov [#allocation8]  }
 0x25b   : > { %725 = vrot.lane.b32.xlu1 %v2775_v14, %s2555_s25  ;;  %723 = vrot.lane.b32.xlu0 %v2781_v19, %s2557_s10 }
 0x25f   : > { %913 = vrot.lane.b32.xlu1 %v2781_v19, %s2558_s12  ;;  %907 = vrot.lane.b32.xlu0 %v2775_v14, %s2559_s21 }
 0x263   : > { %911 = vrot.lane.b32.xlu1 %v2775_v14, %s2558_s12 }
 0x267   : > { %909 = vrot.lane.b32.xlu1 %v2781_v19, %s2559_s21 }
 0x2c5   : > { %v728_v20 = vpop.permute.xlu1 %727  ;;  %v548_v21 = vpop.permute.xlu0 %547 }
 0x2c6   : > { %v560_v22 = vsel %vm549_vm1, %v548_v21, 0  ;;  %2148 = vmatprep.subr.msk.bf16.mxu1 %vm549_vm1, %v548_v21  ;;  %2150 = vmatprep.subr.msk.bf16.mxu0 %vm549_vm1, %v728_v20  ;;  %v739_v23 = vsel %vm549_vm1, %v728_v20, 0 }
 0x2c7   : > { %2073 = vmatpush3.bf16.xpose.msra.mxu1 %v560_v22  ;;  %2089 = vmatpush3.bf16.xpose.msra.mxu0 %v739_v23 }
 0x2c9   : > { %v546_v24 = vpop.permute.xlu1 %545  ;;  %v722_v25 = vpop.permute.xlu0 %721 }
 0x2ca   : > { %2149 = vmatprep.subr.msk.bf16.mxu1 %vm549_vm1, %v546_v24  ;;  %2092 = vmatprep.mubr.msk.bf16.mxu0 %vm549_vm1, %v722_v25  ;;  %v557_v29 = vsel %vm549_vm1, %v546_v24, 0 }
 0x2cd   : > { %v726_v27 = vpop.permute.xlu1 %725  ;;  %v724_v31 = vpop.permute.xlu0 %723 }
 0x2ce   : > { %2151 = vmatprep.subr.msk.bf16.mxu0 %vm549_vm1, %v726_v27  ;;  %v736_v30 = vsel %vm549_vm1, %v726_v27, 0 }
 0x2cf   : > { %2075 = vmatpush3.bf16.xpose.msra.mxu1 %v557_v29  ;;  %2091 = vmatpush3.bf16.xpose.msra.mxu0 %v736_v30 }
 0x2d0   : > { %2080 = vmatprep.subr.bf16.mxu1 %v2807_v28 }
 0x2d1   : > { %v914_v33 = vpop.permute.xlu1 %913  ;;  %v908_v35 = vpop.permute.xlu0 %907 }
 0x2d2   : > { %2152 = vmatprep.subr.msk.bf16.mxu0 %vm549_vm1, %v914_v33  ;;  %v925_v34 = vsel %vm549_vm1, %v914_v33, 0 }
 0x2d5   : > { %v912_v36 = vpop.permute.xlu1 %911 }
 0x2d6   : > { %2077 = vmatmul.mubr.msk.bf16.vlgmr.msra.gmra.mxu1 %vm549_vm1, %v2781_v19  ;;  %2093 = vmatmul.mubr.msk.bf16.vlgmr.msra.gmra.mxu0 %vm549_vm1, %v724_v31  ;;  %v922_v37 = vsel %vm549_vm1, %v912_v36, 0 }
 0x2d7   : > { %2081 = vmatpush3.bf16.msra.mxu1 %v2807_v28  ;;  %2105 = vmatpush3.bf16.xpose.msra.mxu0 %v925_v34 }
 0x2d8   : > { %2108 = vmatprep.mubr.msk.bf16.mxu0 %vm549_vm1, %v908_v35  ;;  %2082 = vmatprep.subr.bf16.mxu1 %v2777_v15 }
 0x2d9   : > { %2153 = vmatprep.subr.msk.bf16.mxu0 %vm549_vm1, %v912_v36  ;;  %v910_v38 = vpop.permute.xlu1 %909 }
 0x2db   : > { %2083 = vmatpush3.bf16.msra.mxu1 %v2777_v15 }
 0x2df   : > { %2107 = vmatpush3.bf16.xpose.msra.mxu0 %v922_v37 }
 0x2e6   : > { %2109 = vmatmul.mubr.msk.bf16.vlgmr.msra.gmra.mxu0 %vm549_vm1, %v910_v38 }
 0x396   : > { %v2078_v39 = vpop.f32.mrf.mxu1  ;;  %v2094_v40 = vpop.f32.mrf.mxu0 }
 0x397   : > { %v613_v42 = vmul.f32 0.25, %v2078_v39  ;;  %v792_v43 = vmul.f32 0.25, %v2094_v40 }
 0x398   : > { %v596_v44 = vpop.f32.mrf.mxu1  ;;  %v775_v45 = vpop.f32.mrf.mxu0 }
 0x399   : > { %v2828_v46 = vadd.f32 %v613_v42, %v2825_v41  ;;  %v2833_v53 = vadd.f32 %v792_v43, %v2825_v41  ;;  %v611_v54 = vmul.f32 0.25, %v596_v44  ;;  %v790_v0 = vmul.f32 0.25, %v775_v45 }
 0x39a   : > { %v2079_v47 = vpop.f32.mrf.mxu1  ;;  %v2095_v48 = vpop.f32.mrf.mxu0 }
 0x39b   : > { %v793_v55 = vmul.f32 0.25, %v2095_v48  ;;  %v626_v57 = vsel %vm619_vm2, %v2828_v46, -inf  ;;  %v804_v1 = vsel %vm619_vm2, %v2833_v53, -inf  ;;  %v615_v4 = vadd.f32 %v611_v54, %v2837_v60 }
 0x39c   : > { %v778_v58 = vpop.f32.mrf.mxu0  ;;  %627 = vmax.xlane.f32.xlu0 %v626_v57  ;;  %v599_v59 = vpop.f32.mrf.mxu1  ;;  %v614_v6 = vmul.f32 0.25, %v2079_v47  ;;  %v794_v9 = vadd.f32 %v790_v0, %v2837_v60 }
 0x39d   : > { %v612_v62 = vmul.f32 0.25, %v599_v59  ;;  %v2842_v63 = vadd.f32 %v793_v55, %v2830_v49  ;;  %v791_v2 = vmul.f32 0.25, %v778_v58  ;;  %v620_v7 = vsel %vm619_vm2, %v615_v4, -inf }
 0x39e   : > { %v798_v13 = vsel %vm619_vm2, %v794_v9, -inf  ;;  %v618_v17 = vadd.f32 %v614_v6, %v2830_v49 }
 0x39f   : > { %v807_v3 = vsel %vm619_vm2, %v2842_v63, -inf  ;;  %v616_v5 = vadd.f32 %v612_v62, %v2839_v61  ;;  %v795_v10 = vadd.f32 %v791_v2, %v2839_v61 }
 0x3a0   : > { %808 = vmax.xlane.f32.xlu1 %v807_v3  ;;  %805 = vmax.xlane.f32.xlu0 %v804_v1  ;;  %v629_v21 = vsel %vm619_vm2, %v618_v17, -inf }
 0x3a1   : > { %v623_v8 = vsel %vm619_vm2, %v616_v5, -inf  ;;  %v801_v16 = vsel %vm619_vm2, %v795_v10, -inf }
 0x3a4   : > { %621 = vmax.xlane.f32.xlu0 %v620_v7  ;;  %624 = vmax.xlane.f32.xlu1 %v623_v8 }
 0x3a6   : > { %v2110_v11 = vpop.f32.mrf.mxu0 }
 0x3a7   : > { %v978_v12 = vmul.f32 0.25, %v2110_v11 }
 0x3a8   : > { %v961_v18 = vpop.f32.mrf.mxu0  ;;  %799 = vmax.xlane.f32.xlu0 %v798_v13  ;;  %802 = vmax.xlane.f32.xlu1 %v801_v16 }
 0x3a9   : > { %v976_v20 = vmul.f32 0.25, %v961_v18  ;;  %v2859_v22 = vadd.f32 %v978_v12, %v2825_v41 }
 0x3aa   : > { %v2111_v26 = vpop.f32.mrf.mxu0 }
 0x3ab   : > { %v990_v23 = vsel %vm619_vm2, %v2859_v22, -inf  ;;  %v2864_v24 = vadd.f32 %v976_v20, %v2837_v60  ;;  %v979_v27 = vmul.f32 0.25, %v2111_v26 }
 0x3ac   : > { %630 = vmax.xlane.f32.xlu0 %v629_v21  ;;  %v964_v29 = vpop.f32.mrf.mxu0 }
 0x3ad   : > { %v984_v25 = vsel %vm619_vm2, %v2864_v24, -inf  ;;  %v977_v30 = vmul.f32 0.25, %v964_v29  ;;  %v2879_v31 = vadd.f32 %v979_v27, %v2830_v49 }
 0x3af   : > { %v993_v33 = vsel %vm619_vm2, %v2879_v31, -inf  ;;  %v2884_v34 = vadd.f32 %v977_v30, %v2839_v61 }
 0x3b0   : > { %991 = vmax.xlane.f32.xlu0 %v990_v23 }
 0x3b1   : > { %v987_v35 = vsel %vm619_vm2, %v2884_v34, -inf }
 0x3b4   : > { %985 = vmax.xlane.f32.xlu0 %v984_v25 }
 0x3b9   : > { %838 = vrot.lane.b32.xlu1 %v2777_v15, %s2557_s10 }
 0x3bd   : > { %1024 = vrot.lane.b32.xlu1 %v2807_v28, %s2559_s21 }
 0x3ca   : > { %840 = vrot.lane.b32.xlu0 %v2807_v28, %s2557_s10  ;;  %s2481_s10 = sshll.u32 %s2562_s26, 4  ;;  %s2482_s10 = int_to_ptr.vmem [resolvable:$false] %s2481_s10 }
 0x3ce   : > { %1097 = vrot.lane.b32.xlu0 %v2781_v19, %s2560_s22 }
 0x3d2   : > { %1091 = vrot.lane.b32.xlu0 %v2775_v14, %s2561_s17 }
 0x3e1   : > { %994 = vmax.xlane.f32.xlu1 %v993_v33 }
 0x3e5   : > { %988 = vmax.xlane.f32.xlu1 %v987_v35 }
 0x3f6   : > { %1022 = vrot.lane.b32.xlu1 %v2777_v15, %s2559_s21 }
 0x3fa   : > { %1095 = vrot.lane.b32.xlu1 %v2775_v14, %s2560_s22 }
 0x3fe   : > { %1093 = vrot.lane.b32.xlu1 %v2781_v19, %s2561_s17 }
 0x425   : > { %v628_v36 = vpop.xlane.xlu0 %627 }
 0x426   : > { %v634_v44 = vsub.f32 %v2828_v46, %v628_v36 }
 0x428   : > { %v640_v14 = vmul.f32 1.442695, %v634_v44 }
 0x429   : > { %v809_v37 = vpop.xlane.xlu1 %808  ;;  %v806_v38 = vpop.xlane.xlu0 %805 }
 0x42a   : > { %v813_v0 = vsub.f32 %v2842_v63, %v809_v37  ;;  %v812_v1 = vsub.f32 %v2833_v53, %v806_v38 }
 0x42c   : > { %v820_v3 = vmul.f32 1.442695, %v813_v0 }
 0x42d   : > { %v622_v39 = vpop.xlane.xlu0 %621  ;;  %v625_v40 = vpop.xlane.xlu1 %624 }
 0x42e   : > { %v632_v42 = vsub.f32 %v615_v4, %v622_v39  ;;  %v633_v43 = vsub.f32 %v616_v5, %v625_v40  ;;  %v818_v4 = vmul.f32 1.442695, %v812_v1 }
 0x430   : > { %v636_v45 = vmul.f32 1.442695, %v632_v42  ;;  %v638_v47 = vmul.f32 1.442695, %v633_v43 }
 0x431   : > { %v800_v48 = vpop.xlane.xlu0 %799  ;;  %v803_v54 = vpop.xlane.xlu1 %802 }
 0x432   : > { %2322 = vpow2.f32 %v636_v45  ;;  %v810_v55 = vsub.f32 %v794_v9, %v800_v48  ;;  %v811_v57 = vsub.f32 %v795_v10, %v803_v54 }
 0x433   : > { %2324 = vpow2.f32 %v638_v47 }
 0x434   : > { %v814_v58 = vmul.f32 1.442695, %v810_v55  ;;  %v816_v19 = vmul.f32 1.442695, %v811_v57  ;;  %2326 = vpow2.f32 %v640_v14 }
 0x435   : > { %v631_v59 = vpop.xlane.xlu0 %630  ;;  %v839_v13 = vpop.permute.xlu1 %838 }
 0x436   : > { %v635_v62 = vsub.f32 %v618_v17, %v631_v59  ;;  %2328 = vpow2.f32 %v814_v58 }
 0x437   : > { %2330 = vpow2.f32 %v816_v19 }
 0x438   : > { %v642_v46 = vmul.f32 1.442695, %v635_v62 }
 0x439   : > { %v992_v2 = vpop.xlane.xlu0 %991  ;;  %v1025_v20 = vpop.permute.xlu1 %1024 }
 0x43a   : > { %2332 = vpow2.f32 %v642_v46  ;;  %v998_v27 = vsub.f32 %v2859_v22, %v992_v2 }
 0x43b   : > { %2334 = vpow2.f32 %v820_v3 }
 0x43c   : > { %2336 = vpow2.f32 %v818_v4  ;;  %v1004_v36 = vmul.f32 1.442695, %v998_v27 }
 0x43d   : > { %v986_v5 = vpop.xlane.xlu0 %985 }
 0x43e   : > { %v996_v23 = vsub.f32 %v2864_v24, %v986_v5 }
 0x43f   : > { %v2897_v6 = vpop.eup %2322 }
 0x440   : > { %v2899_v7 = vpop.eup %2324  ;;  %v1000_v29 = vmul.f32 1.442695, %v996_v23 }
 0x441   : > { %v841_v8 = vpop.permute.xlu0 %840  ;;  %v656_v63 = vpack.c.bf16 %v2899_v7, %v2897_v6  ;;  %v2904_v53 = vpop.eup %2326 }
 0x442   : > { %2096 = vmatprep.subr.bf16.mxu1 %v841_v8  ;;  %2338 = vpow2.f32 %v1000_v29 }
 0x443   : > { %2084 = vmatprep.mubr.msk.bf16.mxu1 %vm619_vm2, %v656_v63  ;;  %v2906_v9 = vpop.eup %2328 }
 0x444   : > { %v2908_v10 = vpop.eup %2330 }
 0x445   : > { %v834_v16 = vpack.c.bf16 %v2908_v10, %v2906_v9  ;;  %v1098_v39 = vpop.permute.xlu0 %1097 }
 0x446   : > { %v1109_v43 = vsel %vm549_vm1, %v1098_v39, 0 }
 0x447   : > { %v2910_v11 = vpop.eup %2332 }
 0x448   : > { %v657_v12 = vpack.c.bf16 %v2910_v11, %v2904_v53  ;;  %v2918_v17 = vpop.eup %2334 }
 0x449   : > { %v2920_v18 = vpop.eup %2336  ;;  %v1092_v44 = vpop.permute.xlu0 %1091 }
 0x44a   : > { %2085 = vmatmul.mubr.msk.bf16.vlgmr.msra.gmra.mxu1 %vm619_vm2, %v657_v12  ;;  %v835_v21 = vpack.c.bf16 %v2918_v17, %v2920_v18 }
 0x44b   : > { %2097 = vmatpush3.bf16.msra.mxu1 %v841_v8  ;;  %2100 = vmatprep.mubr.msk.bf16.mxu1 %vm619_vm2, %v834_v16 }
 0x44c   : > { %2098 = vmatprep.subr.bf16.mxu1 %v839_v13 }
 0x44f   : > { %2099 = vmatpush3.bf16.msra.mxu1 %v839_v13  ;;  %v2930_v24 = vpop.eup %2338 }
 0x450   : > { %2112 = vmatprep.subr.bf16.mxu1 %v1025_v20 }
 0x452   : > { %2101 = vmatmul.mubr.msk.bf16.vlgmr.msra.gmra.mxu1 %vm619_vm2, %v835_v21 }
 0x453   : > { %2113 = vmatpush3.bf16.msra.mxu1 %v1025_v20 }
 0x46a   : > { %v995_v25 = vpop.xlane.xlu1 %994 }
 0x46b   : > { %v999_v26 = vsub.f32 %v2879_v31, %v995_v25 }
 0x46d   : > { %v1006_v30 = vmul.f32 1.442695, %v999_v26 }
 0x46e   : > { %v989_v33 = vpop.xlane.xlu1 %988 }
 0x46f   : > { %v997_v35 = vsub.f32 %v2884_v34, %v989_v33  ;;  %2340 = vpow2.f32 %v1006_v30  ;;  %v828_v30 = vsel %vm619_vm2, %v2920_v18, 0.0 }
 0x471   : > { %v1002_v37 = vmul.f32 1.442695, %v997_v35 }
 0x472   : > { %v1023_v38 = vpop.permute.xlu1 %1022 }
 0x473   : > { %2342 = vpow2.f32 %v1002_v37  ;;  %2114 = vmatprep.subr.bf16.mxu1 %v1023_v38 }
 0x474   : > { %2344 = vpow2.f32 %v1004_v36  ;;  %2115 = vmatpush3.bf16.msra.mxu1 %v1023_v38 }
 0x475   : > { %2154 = vmatprep.subr.msk.bf16.mxu1 %vm549_vm1, %v1098_v39 }
 0x476   : > { %v1096_v45 = vpop.permute.xlu1 %1095 }
 0x477   : > { %v1106_v47 = vsel %vm549_vm1, %v1096_v45, 0 }
 0x47a   : > { %v1094_v48 = vpop.permute.xlu1 %1093 }
 0x47c   : > { %v2932_v22 = vpop.eup %2340 }
 0x480   : > { %v2343_v31 = vpop.eup %2342 }
 0x481   : > { %v2934_v40 = vpop.eup %2344  ;;  %v1020_v34 = vpack.c.bf16 %v2343_v31, %v2930_v24 }
 0x482   : > { %v1021_v42 = vpack.c.bf16 %v2932_v22, %v2934_v40 }
 0x483   : > { %2116 = vmatprep.mubr.msk.bf16.mxu1 %vm619_vm2, %v1020_v34 }
 0x484   : > { %2117 = vmatmul.mubr.msk.bf16.vlgmr.msra.gmra.mxu1 %vm619_vm2, %v1021_v42 }
 0x485   : > { %2121 = vmatpush3.bf16.xpose.msra.mxu1 %v1109_v43  ;;  %2124 = vmatprep.mubr.msk.bf16.mxu1 %vm549_vm1, %v1092_v44 }
 0x486   : > { %2155 = vmatprep.subr.msk.bf16.mxu1 %vm549_vm1, %v1096_v45 }
 0x48d   : > { %2123 = vmatpush3.bf16.xpose.msra.mxu1 %v1106_v47 }
 0x494   : > { %2125 = vmatmul.mubr.msk.bf16.vlgmr.msra.gmra.mxu1 %vm549_vm1, %v1094_v48 }
 0x495   : > { %1600 = vmatprep.mubr.bf16.mxu1 %v2554_v32 }
 0x50a   : > { %v2947_v54 = vpop.f32.mrf.mxu1 }
 0x50c   : > { %v2949_v55 = vpop.f32.mrf.mxu1 }
 0x50e   : > { %v2951_v57 = vpop.f32.mrf.mxu1 }
 0x510   : > { %v2953_v14 = vpop.f32.mrf.mxu1 }
 0x512   : > { %v2955_v58 = vpop.f32.mrf.mxu1 }
 0x514   : > { %v2957_v19 = vpop.f32.mrf.mxu1 }
 0x516   : > { %v2959_v59 = vpop.f32.mrf.mxu1 }
 0x518   : > { %v2961_v62 = vpop.f32.mrf.mxu1 }
 0x544   : > { %v2963_v0 = vpop.f32.mrf.mxu1 }
 0x546   : > { %v2965_v1 = vpop.f32.mrf.mxu1 }
 0x548   : > { %v2967_v46 = vpop.f32.mrf.mxu1 }
 0x54a   : > { %v2969_v2 = vpop.f32.mrf.mxu1 }
 0x554   : > { %v2126_v3 = vpop.f32.mrf.mxu1 }
 0x555   : > { %v1162_v4 = vmul.f32 0.25, %v2126_v3 }
 0x556   : > { %v1145_v5 = vpop.f32.mrf.mxu1 }
 0x557   : > { %v1160_v8 = vmul.f32 0.25, %v1145_v5  ;;  %v1166_v63 = vadd.f32 %v1162_v4, %v2825_v41 }
 0x558   : > { %v2127_v12 = vpop.f32.mrf.mxu1 }
 0x559   : > { %v1163_v13 = vmul.f32 0.25, %v2127_v12  ;;  %v1174_v16 = vsel %vm619_vm2, %v1166_v63, -inf  ;;  %v1164_v20 = vadd.f32 %v1160_v8, %v2837_v60  ;;  %v822_v60 = vsel %vm619_vm2, %v2906_v9, 0.0 }
 0x55a   : > { %1175 = vmax.xlane.f32.xlu0 %v1174_v16  ;;  %v1148_v21 = vpop.f32.mrf.mxu1  ;;  %v1017_v9 = vsel %vm619_vm2, %v2932_v22, 0.0  ;;  %v644_v12 = vsel %vm619_vm2, %v2897_v6, 0.0  ;;  %v650_v16 = vsel %vm619_vm2, %v2904_v53, 0.0 }
 0x55b   : > { %v1161_v23 = vmul.f32 0.25, %v1148_v21  ;;  %v1168_v25 = vsel %vm619_vm2, %v1164_v20, -inf  ;;  %v1167_v27 = vadd.f32 %v1163_v13, %v2830_v49  ;;  %v825_v49 = vsel %vm619_vm2, %v2908_v10, 0.0 }
 0x55c   : > { %v1014_v10 = vsel %vm619_vm2, %v2934_v40, 0.0  ;;  %v647_v13 = vsel %vm619_vm2, %v2899_v7, 0.0 }
 0x55d   : > { %v1165_v26 = vadd.f32 %v1161_v23, %v2839_v61  ;;  %v1177_v41 = vsel %vm619_vm2, %v1167_v27, -inf  ;;  %v831_v61 = vsel %vm619_vm2, %v2918_v17, 0.0 }
 0x55e   : > { %1169 = vmax.xlane.f32.xlu0 %v1168_v25 }
 0x55f   : > { %v1171_v29 = vsel %vm619_vm2, %v1165_v26, -inf }
 0x560   : > { %1172 = vmax.xlane.f32.xlu1 %v1171_v29 }
 0x562   : > { %1178 = vmax.xlane.f32.xlu0 %v1177_v41 }
 0x571   : > { %1206 = vrot.lane.b32.xlu1 %v2777_v15, %s2561_s17  ;;  %v1011_v15 = vsel %vm619_vm2, %v2343_v31, 0.0 }
 0x578   : > { %1208 = vrot.lane.b32.xlu0 %v2807_v28, %s2561_s17  ;;  %v1008_v28 = vsel %vm619_vm2, %v2930_v24, 0.0 }
 0x595   : > { %823 = vadd.xlane.f32.xlu1 %v822_v60 }
 0x597   : > { %826 = vadd.xlane.f32.xlu0 %v825_v49 }
 0x599   : > { %832 = vadd.xlane.f32.xlu1 %v831_v61 }
 0x59b   : > { %829 = vadd.xlane.f32.xlu0 %v828_v30 }
 0x59d   : > { %1012 = vadd.xlane.f32.xlu1 %v1011_v15 }
 0x59f   : > { %1009 = vadd.xlane.f32.xlu0 %v1008_v28 }
 0x5a1   : > { %1018 = vadd.xlane.f32.xlu1 %v1017_v9 }
 0x5a3   : > { %1015 = vadd.xlane.f32.xlu0 %v1014_v10 }
 0x5e3   : > { %v1176_v17 = vpop.xlane.xlu0 %1175 }
 0x5e4   : > { %v1182_v33 = vsub.f32 %v1166_v63, %v1176_v17 }
 0x5e6   : > { %v1188_v36 = vmul.f32 1.442695, %v1182_v33 }
 0x5e7   : > { %v1170_v35 = vpop.xlane.xlu0 %1169 }
 0x5e8   : > { %v1180_v18 = vsub.f32 %v1164_v20, %v1170_v35  ;;  %v653_v20 = vsel %vm619_vm2, %v2910_v11, 0.0 }
 0x5e9   : > { %v1173_v37 = vpop.xlane.xlu1 %1172 }
 0x5ea   : > { %v1184_v38 = vmul.f32 1.442695, %v1180_v18  ;;  %v1181_v39 = vsub.f32 %v1165_v26, %v1173_v37 }
 0x5eb   : > { %v1179_v31 = vpop.xlane.xlu0 %1178 }
 0x5ec   : > { %2346 = vpow2.f32 %v1184_v38  ;;  %v1186_v24 = vmul.f32 1.442695, %v1181_v39  ;;  %v1183_v34 = vsub.f32 %v1167_v27, %v1179_v31  ;;  %v2283_v38 = vld [vmem:[#allocation7 + $0x10] sm:$0xff]  }
 0x5ed   : > { %2348 = vpow2.f32 %v1188_v36  ;;  %v1207_v40 = vpop.permute.xlu1 %1206 }
 0x5ee   : > { %2350 = vpow2.f32 %v1186_v24  ;;  %v1190_v22 = vmul.f32 1.442695, %v1183_v34 }
 0x5ef   : > { %v1209_v42 = vpop.permute.xlu0 %1208 }
 0x5f0   : > { %2352 = vpow2.f32 %v1190_v22  ;;  %2128 = vmatprep.subr.bf16.mxu0 %v1209_v42 }
 0x5f1   : > { %2129 = vmatpush3.bf16.msra.mxu0 %v1209_v42 }
 0x5f2   : > { %2130 = vmatprep.subr.bf16.mxu0 %v1207_v40 }
 0x5f5   : > { %2131 = vmatpush3.bf16.msra.mxu0 %v1207_v40 }
 0x5f9   : > { %v2347_v43 = vpop.eup %2346 }
 0x5fa   : > { %v2349_v44 = vpop.eup %2348  ;;  %v1192_v45 = vsel %vm619_vm2, %v2347_v43, 0.0 }
 0x5fb   : > { %v2351_v47 = vpop.eup %2350  ;;  %1193 = vadd.xlane.f32.xlu0 %v1192_v45  ;;  %v1198_v5 = vsel %vm619_vm2, %v2349_v44, 0.0 }
 0x5fc   : > { %v1195_v48 = vsel %vm619_vm2, %v2351_v47, 0.0  ;;  %v1204_v3 = vpack.c.bf16 %v2351_v47, %v2347_v43 }
 0x5fd   : > { %v2353_v4 = vpop.eup %2352  ;;  %1196 = vadd.xlane.f32.xlu1 %v1195_v48 }
 0x5fe   : > { %2132 = vmatprep.mubr.msk.bf16.mxu0 %vm619_vm2, %v1204_v3  ;;  %v1205_v8 = vpack.c.bf16 %v2353_v4, %v2349_v44  ;;  %v1201_v63 = vsel %vm619_vm2, %v2353_v4, 0.0 }
 0x5ff   : > { %1199 = vadd.xlane.f32.xlu0 %v1198_v5 }
 0x600   : > { %2133 = vmatmul.mubr.msk.bf16.vlgmr.msra.gmra.mxu0 %vm619_vm2, %v1205_v8 }
 0x601   : > { %1202 = vadd.xlane.f32.xlu1 %v1201_v63 }
 0x603   : > { %645 = vadd.xlane.f32.xlu0 %v644_v12 }
 0x605   : > { %648 = vadd.xlane.f32.xlu1 %v647_v13 }
 0x607   : > { %651 = vadd.xlane.f32.xlu0 %v650_v16 }
 0x609   : > { %654 = vadd.xlane.f32.xlu1 %v653_v20 }
 0x61e   : > { %v824_v21 = vpop.xlane.xlu1 %823 }
 0x61f   : > { %2354 = vrcp.f32 %v824_v21 }
 0x620   : > { %v827_v23 = vpop.xlane.xlu0 %826 }
 0x621   : > { %2356 = vrcp.f32 %v827_v23 }
 0x622   : > { %v833_v25 = vpop.xlane.xlu1 %832 }
 0x623   : > { %2358 = vrcp.f32 %v833_v25 }
 0x624   : > { %v830_v6 = vpop.xlane.xlu0 %829 }
 0x625   : > { %2360 = vrcp.f32 %v830_v6 }
 0x626   : > { %v1013_v26 = vpop.xlane.xlu1 %1012 }
 0x627   : > { %2362 = vrcp.f32 %v1013_v26 }
 0x628   : > { %v1010_v7 = vpop.xlane.xlu0 %1009 }
 0x629   : > { %2364 = vrcp.f32 %v1010_v7 }
 0x62a   : > { %v1019_v27 = vpop.xlane.xlu1 %1018 }
 0x62b   : > { %2366 = vrcp.f32 %v1019_v27 }
 0x62c   : > { %v2355_v53 = vpop.eup %2354  ;;  %v1016_v29 = vpop.xlane.xlu0 %1015 }
 0x62d   : > { %2368 = vrcp.f32 %v1016_v29  ;;  %v903_v11 = vmul.f32 %v2355_v53, %v2957_v19 }
 0x62e   : > { %v2357_v41 = vpop.eup %2356 }
 0x62f   : > { %v904_v60 = vmul.f32 %v2357_v41, %v2961_v62 }
 0x630   : > { %v2359_v49 = vpop.eup %2358 }
 0x631   : > { %v2240_v61 = vpack.i.bf16 %v904_v60, %v903_v11  ;;  %v906_v28 = vmul.f32 %v2359_v49, %v2959_v59  ;;  %v2282_v59 = vld [vmem:[#allocation7 + $0x18] sm:$0xff]  }
 0x632   : > { %v2361_v30 = vpop.eup %2360  ;;  %2136 = vmatprep.subr.bf16.mxu0 %v2282_v59 }
 0x633   : > { %2241 = vrot.lane.b32.xlu0 %v2240_v61, %s2560_s22  ;;  %v905_v15 = vmul.f32 %v2361_v30, %v2955_v58  ;;  %2137 = vmatpush3.bf16.msra.mxu0 %v2282_v59 }
 0x634   : > { %v2363_v9 = vpop.eup %2362  ;;  %2138 = vmatprep.subr.bf16.mxu0 %v2283_v38 }
 0x635   : > { %v2245_v10 = vpack.i.bf16 %v906_v28, %v905_v15  ;;  %v1088_v19 = vmul.f32 %v2363_v9, %v2969_v2 }
 0x636   : > { %v2365_v17 = vpop.eup %2364 }
 0x637   : > { %2246 = vrot.lane.b32.xlu1 %v2245_v10, %s2560_s22  ;;  %v1087_v33 = vmul.f32 %v2365_v17, %v2965_v1  ;;  %2139 = vmatpush3.bf16.msra.mxu0 %v2283_v38  ;;  %s339_s22 = sand.u32 1, %s2537_s28  }
 0x638   : > { %v2367_v35 = vpop.eup %2366  ;;  %s1939_s17 = sshll.u32 %s339_s22, 5  ;;  %s3205_s9 = scalar_lea.sflag [#allocation4], %s339_s22 }
 0x639   : > { %v2250_v62 = vpack.i.bf16 %v1088_v19, %v1087_v33  ;;  %v1090_v58 = vmul.f32 %v2367_v35, %v2967_v46  ;;  %v2285_v46 = vld [vmem:[#allocation7] sm:$0xff]  }
 0x63a   : > { %v2369_v18 = vpop.eup %2368 }
 0x63b   : > { %2251 = vrot.lane.b32.xlu1 %v2250_v62, %s2558_s12  ;;  %v1089_v36 = vmul.f32 %v2369_v18, %v2963_v0  ;;  %v2284_v0 = vld [vmem:[#allocation7 + $0x8] sm:$0xff]  }
 0x63c   : > { %2140 = vmatprep.subr.bf16.mxu0 %v2284_v0 }
 0x63d   : > { %v2255_v37 = vpack.i.bf16 %v1090_v58, %v1089_v36  ;;  %2141 = vmatpush3.bf16.msra.mxu0 %v2284_v0 }
 0x63e   : > { %2142 = vmatprep.subr.bf16.mxu0 %v2285_v46 }
 0x63f   : > { %2256 = vrot.lane.b32.xlu1 %v2255_v37, %s2558_s12  ;;  %s2483_s12 = scalar_lea.vmem %s2482_s10, 1024 }
 0x641   : > { %2143 = vmatpush3.bf16.msra.mxu0 %v2285_v46  ;;  %v1348_v46 = vsub.s32 2, %v2758_v50 }
 0x684   : > { %v1194_v1 = vpop.xlane.xlu0 %1193 }
 0x686   : > { %v1197_v2 = vpop.xlane.xlu1 %1196 }
 0x688   : > { %v1200_v39 = vpop.xlane.xlu0 %1199 }
 0x689   : > { %2370 = vrcp.f32 %v1200_v39 }
 0x68a   : > { %v1203_v31 = vpop.xlane.xlu1 %1202 }
 0x68b   : > { %2372 = vrcp.f32 %v1203_v31 }
 0x68c   : > { %2374 = vrcp.f32 %v1194_v1  ;;  %v646_v63 = vpop.xlane.xlu0 %645 }
 0x68d   : > { %2376 = vrcp.f32 %v1197_v2 }
 0x68e   : > { %v649_v12 = vpop.xlane.xlu1 %648  ;;  %2378 = vrcp.f32 %v646_v63 }
 0x68f   : > { %2380 = vrcp.f32 %v649_v12  ;;  %v2397_v12 = vld [vmem:[%s2711_s13 + $0x18] sm:$0xff] }
 0x690   : > { %v652_v13 = vpop.xlane.xlu0 %651 }
 0x691   : > { %2382 = vrcp.f32 %v652_v13 }
 0x692   : > { %v655_v16 = vpop.xlane.xlu1 %654 }
 0x693   : > { %2384 = vrcp.f32 %v655_v16 }
 0x696   : > { %v2371_v22 = vpop.eup %2370 }
 0x698   : > { %v2373_v42 = vpop.eup %2372 }
 0x699   : > { %v2375_v43 = vpop.eup %2374 }
 0x69a   : > { %v2377_v47 = vpop.eup %2376 }
 0x69b   : > { %v2379_v23 = vpop.eup %2378 }
 0x69c   : > { %v2381_v25 = vpop.eup %2380  ;;  %v717_v60 = vmul.f32 %v2379_v23, %v2949_v55 }
 0x69d   : > { %v718_v49 = vmul.f32 %v2381_v25, %v2953_v14 }
 0x69e   : > { %v2383_v26 = vpop.eup %2382 }
 0x69f   : > { %v719_v15 = vmul.f32 %v2383_v26, %v2947_v54 }
 0x6a0   : > { %v2385_v27 = vpop.eup %2384 }
 0x6a1   : > { %v720_v28 = vmul.f32 %v2385_v27, %v2951_v57 }
 0x6a5   : > { %v2242_v6 = vpop.permute.xlu0 %2241 }
 0x6a6   : > { %v2244_v53 = vunpack.i.h.bf16 %v2242_v6  ;;  %v2243_v29 = vunpack.i.l.bf16 %v2242_v6 }
 0x6a8   : > { %v1323_v35 = vsel %vm549_vm1, %v717_v60, %v2243_v29  ;;  %v1324_v62 = vsel %vm549_vm1, %v718_v49, %v2244_v53 }
 0x6a9   : > { %v2247_v20 = vpop.permute.xlu1 %2246 }
 0x6aa   : > { %v2249_v41 = vunpack.i.h.bf16 %v2247_v20  ;;  %v2248_v11 = vunpack.i.l.bf16 %v2247_v20 }
 0x6ac   : > { %v1326_v55 = vsel %vm549_vm1, %v720_v28, %v2249_v41  ;;  %v1325_v14 = vsel %vm549_vm1, %v719_v15, %v2248_v11 }
 0x6ad   : > { %v2252_v21 = vpop.permute.xlu1 %2251 }
 0x6ae   : > { %v2254_v9 = vunpack.i.h.bf16 %v2252_v21  ;;  %v2253_v10 = vunpack.i.l.bf16 %v2252_v21 }
 0x6b0   : > { %v1328_v37 = vsel %vm619_vm2, %v1324_v62, %v2254_v9  ;;  %v1327_v59 = vsel %vm619_vm2, %v1323_v35, %v2253_v10  ;;  %v2286_v35 = vld [vmem:[%s3251_s6 + $0x30] ss:$8 sps:$4 sm:$0xff]   ;;  %v2291_v62 = vld [vmem:[%s3251_s6 + $0x24] ss:$8 sps:$4 sm:$0xff]  }
 0x6b1   : > { %v2257_v7 = vpop.permute.xlu1 %2256 }
 0x6b2   : > { %v2259_v61 = vunpack.i.h.bf16 %v2257_v7  ;;  %v2258_v30 = vunpack.i.l.bf16 %v2257_v7 }
 0x6b4   : > { %v1329_v36 = vsel %vm619_vm2, %v1325_v14, %v2258_v30  ;;  %v1330_v54 = vsel %vm619_vm2, %v1326_v55, %v2259_v61  ;;  %v2289_v55 = vld [vmem:[%s3251_s6 + $0x20] ss:$8 sps:$4 sm:$0xff]   ;;  %v2294_v14 = vld [vmem:[%s3251_s6 + $0x14] ss:$8 sps:$4 sm:$0xff]  }
 0x6c0   : > { %v2134_v24 = vpop.f32.mrf.mxu0 }
 0x6c1   : > { %v1273_v44 = vmul.f32 %v2371_v22, %v2134_v24  ;;  %v1349_v24 = vrot.slane %v2761_v52, %v1348_v46  ;;  %v2396_v52 = vld [vmem:[%s2711_s13 + $0x8] sm:$0xff] }
 0x6c2   : > { %v1252_v34 = vpop.f32.mrf.mxu0 }
 0x6c3   : > { %v1271_v3 = vmul.f32 %v2375_v43, %v1252_v34 }
 0x6c4   : > { %v2135_v40 = vpop.f32.mrf.mxu0 }
 0x6c5   : > { %v1274_v45 = vmul.f32 %v2373_v42, %v2135_v40 }
 0x6c6   : > { %v1255_v48 = vpop.f32.mrf.mxu0 }
 0x6c7   : > { %v2265_v4 = vpack.i.bf16 %v1274_v45, %v1273_v44  ;;  %v1272_v5 = vmul.f32 %v2377_v47, %v1255_v48  ;;  %v2394_v44 = vld [vmem:[%s2711_s13] sm:$0xff]  ;;  %v2395_v48 = vld [vmem:[%s2711_s13 + $0x10] sm:$0xff]  ;;  %s341_s13 = scalar_lea.vmem [#allocation8], %s1939_s17 }
 0x6c8   : > { %s1836_s18 = sshll.u32 %s341_s13, 4  ;;  %s3199_s18 = int_to_ptr.vmem [resolvable:$true] %s1836_s18 }
 0x6c9   : > { %v2260_v8 = vpack.i.bf16 %v1272_v5, %v1271_v3  ;;  %2266 = vrot.lane.b32.xlu1 %v2265_v4, %s2555_s25  ;;  %p2484_p4 = scmp.lt.s32.totalorder %s3199_s18, %s2482_s10 }
 0x6cb   : > { %2261 = vrot.lane.b32.xlu0 %v2260_v8, %s2555_s25  ;;  %s2477_s25 = scalar_lea.vmem %s3199_s18, 512 }
 0x6cc   : > { %p2478_p12 = scmp.ne.s32.totalorder %s3199_s18, %s2477_s25  ;;  %p2485_p7 = scmp.lt.s32.totalorder %s2483_s12, %s2477_s25 }
 0x6ce   : > { %p2479_p9 = pnand %p2478_p12, %p3266_p2  ;;  %p2486_p5 = por %p2485_p7, %p2484_p4 }
 0x6d0   : > { %p2480_p3 = pneg %p2479_p9 }
 0x6d2   : > { %p2487_p6 = pnand %p2486_p5, %p2480_p3 }
 0x73b   : > { %v2267_v17 = vpop.permute.xlu1 %2266 }
 0x73c   : > { %v2269_v33 = vunpack.i.h.bf16 %v2267_v17  ;;  %v2268_v19 = vunpack.i.l.bf16 %v2267_v17 }
 0x73d   : > { %v2262_v18 = vpop.permute.xlu0 %2261 }
 0x73e   : > { %v2264_v57 = vunpack.i.h.bf16 %v2262_v18  ;;  %v2263_v58 = vunpack.i.l.bf16 %v2262_v18  ;;  %v1334_v38 = vsel %vm1331_vm3, %v1329_v36, %v2268_v19  ;;  %v1335_v1 = vsel %vm1331_vm3, %v1330_v54, %v2269_v33  ;;  %v2288_v19 = vld [vmem:[%s3251_s6 + $0x34] ss:$8 sps:$4 sm:$0xff]   ;;  %v2292_v18 = vld [vmem:[%s3251_s6 + $0x10] ss:$8 sps:$4 sm:$0xff]   ;;  %v2297_v36 = vld [vmem:[%s3251_s6 + $0x4] ss:$8 sps:$4 sm:$0xff]  }
 0x73f   : > { %v1337_v0 = vpack.c.bf16 %v1335_v1, %v1334_v38  ;;  %1576 = vmatprep.subr.bf16.mxu1 %v2288_v19  ;;  %v2295_v54 = vld [vmem:[%s3251_s6] ss:$8 sps:$4 sm:$0xff]  }
 0x740   : > { %v1332_v2 = vsel %vm1331_vm3, %v1327_v59, %v2263_v58  ;;  %v1333_v39 = vsel %vm1331_vm3, %v1328_v37, %v2264_v57  ;;  %1577 = vmatpush1.bf16.msra.mxu1 %v2286_v35  ;;  %v2298_v57 = vld [vmem:[%s3252_s7 + $0x78] sm:$0xff]   ;;  %v2300_v37 = vld [vmem:[%s3252_s7 + $0x70] sm:$0xff]   ;;  %v2302_v38 = vld [vmem:[%s3252_s7 + $0x68] sm:$0xff]  }
 0x741   : > { %v1336_v31 = vpack.c.bf16 %v1333_v39, %v1332_v2  ;;  %1578 = vmatprep.subr.bf16.mxu1 %v2291_v62  ;;  %v2299_v58 = vld [vmem:[%s3252_s7 + $0x38] sm:$0xff]   ;;  %2044 = vmatprep.subr.bf16.mxu0 %v2298_v57  ;;  %v2301_v59 = vld [vmem:[%s3252_s7 + $0x30] sm:$0xff]   ;;  %v2303_v1 = vld [vmem:[%s3252_s7 + $0x28] sm:$0xff]  }
 0x742   : > { %v2304_v2 = vld [vmem:[%s3252_s7 + $0x60] sm:$0xff]  }
 0x743   : > { %2144 = vmatprep.mubr.msk.bf16.mxu0 %vm356_vm0, %v1336_v31  ;;  %v2305_v39 = vld [vmem:[%s3252_s7 + $0x20] sm:$0xff]   ;;  %v2306_v31 = vld [vmem:[%s3252_s7 + $0x58] sm:$0xff]  }
 0x744   : > { %2145 = vmatmul.mubr.msk.bf16.vlgmr.msra.gmra.mxu0 %vm356_vm0, %v1337_v0  ;;  %1579 = vmatpush1.bf16.msra.mxu1 %v2289_v55  ;;  %v2307_v0 = vld [vmem:[%s3252_s7 + $0x18] sm:$0xff]   ;;  %v2312_v19 = vld [vmem:[%s3252_s7 + $0x40] sm:$0xff]  }
 0x745   : > { %1580 = vmatprep.subr.bf16.mxu1 %v2294_v14  ;;  %2045 = vmatpush3.bf16.msra.mxu0 %v2299_v58  ;;  %v2313_v35 = vld [vmem:[%s3252_s7] sm:$0xff]  }
 0x746   : > { %2046 = vmatprep.subr.bf16.mxu0 %v2300_v37  ;;  %v355_v62 = vld [vmem:[%s3248_s3] sm:$0x3] }
 0x747   : > { %v1519_v14 = vrot.slane %v355_v62, %v420_v56 }
 0x748   : > { %1581 = vmatpush1.bf16.msra.mxu1 %v2292_v18  ;;  %v1515_v18 = vrot.slane %v355_v62, %v412_v51 }
 0x749   : > { %1582 = vmatprep.subr.bf16.mxu1 %v2297_v36  ;;  %2047 = vmatpush3.bf16.msra.mxu0 %v2301_v59 }
 0x74a   : > { %2048 = vmatprep.subr.bf16.mxu0 %v2302_v38 }
 0x74c   : > { %1583 = vmatpush1.bf16.msra.mxu1 %v2295_v54 }
 0x74d   : > { %2049 = vmatpush3.bf16.msra.mxu0 %v2303_v1 }
 0x74e   : > { %2050 = vmatprep.subr.bf16.mxu0 %v2304_v2 }
 0x751   : > { %2051 = vmatpush3.bf16.msra.mxu0 %v2305_v39 }
 0x752   : > { %2052 = vmatprep.subr.bf16.mxu0 %v2306_v31 }
 0x755   : > { %2053 = vmatpush3.bf16.msra.mxu0 %v2307_v0 }
 0x804   : > { %v2146_v34 = vpop.f32.mrf.mxu0 }
 0x805   : > { %v1423_v42 = vadd.f32 %v2146_v34, %v1349_v24 }
 0x806   : > { %v1414_v22 = vpop.f32.mrf.mxu0 }
 0x807   : > { %v1415_v40 = vadd.f32 %v1414_v22, %v1349_v24  ;;  %v3050_v3 = vadd.f32 %v2395_v48, %v1423_v42 }
 0x808   : > { %v2147_v43 = vpop.f32.mrf.mxu0 }
 0x809   : > { %v3047_v45 = vadd.f32 %v2394_v44, %v1415_v40  ;;  %v1426_v4 = vadd.f32 %v2147_v43, %v1349_v24  ;;  %v1439_v20 = vsel %vm356_vm0, %v3050_v3, 0.0 }
 0x80a   : > { %v1417_v47 = vpop.f32.mrf.mxu0 }
 0x80b   : > { %v1418_v5 = vadd.f32 %v1417_v47, %v1349_v24  ;;  %v1433_v8 = vsel %vm356_vm0, %v3047_v45, 0.0  ;;  %v3058_v13 = vadd.f32 %v2397_v12, %v1426_v4 }
 0x80c   : > { %1434 = vadd.xlane.f32.xlu0 %v1433_v8  ;;  %v1487_v8 = vsub.s32 3, %v2758_v50 }
 0x80d   : > { %v3055_v63 = vadd.f32 %v2396_v52, %v1418_v5  ;;  %v1442_v21 = vsel %vm356_vm0, %v3058_v13, 0.0 }
 0x80f   : > { %v1436_v16 = vsel %vm356_vm0, %v3055_v63, 0.0 }
 0x810   : > { %1437 = vadd.xlane.f32.xlu1 %v1436_v16  ;;  %1440 = vadd.xlane.f32.xlu0 %v1439_v20  ;;  %v3146_v16 = vld [vmem:[#allocation5] sm:$0xff] }
 0x811   : > { %v1488_v20 = vrot.slane %v3146_v16, %v1487_v8 }
 0x814   : > { %1443 = vadd.xlane.f32.xlu0 %v1442_v21  ;;  %v1495_v21 = vsub.s32 4, %v2758_v50 }
 0x895   : > { %v1435_v23 = vpop.xlane.xlu0 %1434 }
 0x896   : > { %v1445_v25 = vmul.f32 0.015625, %v1435_v23 }
 0x898   : > { %v3067_v6 = vsub.f32 %v3047_v45, %v1445_v25 }
 0x899   : > { %v1438_v26 = vpop.xlane.xlu1 %1437  ;;  %v1441_v7 = vpop.xlane.xlu0 %1440 }
 0x89a   : > { %v1446_v27 = vmul.f32 0.015625, %v1438_v26  ;;  %v1447_v53 = vmul.f32 0.015625, %v1441_v7  ;;  %v1453_v29 = vmul.f32 %v3067_v6, %v3067_v6  ;;  %v1496_v7 = vrot.slane %v3146_v16, %v1495_v21 }
 0x89c   : > { %v3072_v41 = vsub.f32 %v3055_v63, %v1446_v27  ;;  %v3075_v11 = vsub.f32 %v3050_v3, %v1447_v53  ;;  %v1457_v60 = vsel %vm356_vm0, %v1453_v29, 0.0 }
 0x89d   : > { %1458 = vadd.xlane.f32.xlu0 %v1457_v60  ;;  %v1444_v49 = vpop.xlane.xlu0 %1443 }
 0x89e   : > { %v1448_v61 = vmul.f32 0.015625, %v1444_v49  ;;  %v1454_v30 = vmul.f32 %v3072_v41, %v3072_v41  ;;  %v1455_v15 = vmul.f32 %v3075_v11, %v3075_v11 }
 0x8a0   : > { %v3083_v28 = vsub.f32 %v3058_v13, %v1448_v61  ;;  %v1460_v9 = vsel %vm356_vm0, %v1454_v30, 0.0  ;;  %v1463_v10 = vsel %vm356_vm0, %v1455_v15, 0.0 }
 0x8a1   : > { %1461 = vadd.xlane.f32.xlu1 %v1460_v9  ;;  %1464 = vadd.xlane.f32.xlu0 %v1463_v10 }
 0x8a2   : > { %v1456_v17 = vmul.f32 %v3083_v28, %v3083_v28 }
 0x8a4   : > { %v1466_v33 = vsel %vm356_vm0, %v1456_v17, 0.0 }
 0x8a5   : > { %1467 = vadd.xlane.f32.xlu1 %v1466_v33  ;;  %v2308_v33 = vld [vmem:[%s3252_s7 + $0x50] sm:$0xff]  }
 0x8a6   : > { %2054 = vmatprep.subr.bf16.mxu0 %v2308_v33 }
 0x926   : > { %v1459_v46 = vpop.xlane.xlu0 %1458 }
 0x927   : > { %v1469_v24 = vmul.f32 0.015625, %v1459_v46 }
 0x929   : > { %v1473_v34 = vadd.f32 1e-05, %v1469_v24 }
 0x92a   : > { %v1462_v22 = vpop.xlane.xlu1 %1461  ;;  %v1465_v42 = vpop.xlane.xlu0 %1464 }
 0x92b   : > { %2386 = vrsqrt.f32 %v1473_v34  ;;  %v1470_v40 = vmul.f32 0.015625, %v1462_v22  ;;  %v1471_v43 = vmul.f32 0.015625, %v1465_v42 }
 0x92d   : > { %v1474_v44 = vadd.f32 1e-05, %v1470_v40  ;;  %v1475_v47 = vadd.f32 1e-05, %v1471_v43 }
 0x92e   : > { %v1468_v48 = vpop.xlane.xlu1 %1467 }
 0x92f   : > { %2388 = vrsqrt.f32 %v1474_v44  ;;  %v1472_v4 = vmul.f32 0.015625, %v1468_v48 }
 0x930   : > { %2390 = vrsqrt.f32 %v1475_v47 }
 0x931   : > { %v1476_v5 = vadd.f32 1e-05, %v1472_v4 }
 0x933   : > { %2392 = vrsqrt.f32 %v1476_v5 }
 0x938   : > { %v2387_v52 = vpop.eup %2386 }
 0x939   : > { %v1481_v12 = vmul.f32 %v2387_v52, %v3067_v6  ;;  %v1667_v52 = vsub.s32 5, %v2758_v50 }
 0x93b   : > { %v1489_v26 = vmul.f32 %v1488_v20, %v1481_v12 }
 0x93c   : > { %v2389_v23 = vpop.eup %2388 }
 0x93d   : > { %v1482_v25 = vmul.f32 %v2389_v23, %v3072_v41  ;;  %v2391_v27 = vpop.eup %2390  ;;  %v1497_v60 = vadd.f32 %v1496_v7, %v1489_v26 }
 0x93e   : > { %v1483_v61 = vmul.f32 %v2391_v27, %v3075_v11  ;;  %v2309_v11 = vld [vmem:[%s3252_s7 + $0x10] sm:$0xff]  }
 0x93f   : > { %v1490_v53 = vmul.f32 %v1488_v20, %v1482_v25  ;;  %2055 = vmatpush3.bf16.msra.mxu0 %v2309_v11 }
 0x940   : > { %v2393_v29 = vpop.eup %2392  ;;  %v1491_v9 = vmul.f32 %v1488_v20, %v1483_v61 }
 0x941   : > { %v1498_v49 = vadd.f32 %v1496_v7, %v1490_v53  ;;  %v1484_v6 = vmul.f32 %v2393_v29, %v3083_v28  ;;  %v2310_v28 = vld [vmem:[%s3252_s7 + $0x48] sm:$0xff]  }
 0x942   : > { %v1499_v10 = vadd.f32 %v1496_v7, %v1491_v9  ;;  %2056 = vmatprep.subr.bf16.mxu0 %v2310_v28 }
 0x943   : > { %v1501_v30 = vpack.c.bf16 %v1498_v49, %v1497_v60  ;;  %v1492_v15 = vmul.f32 %v1488_v20, %v1484_v6  ;;  %v1668_v20 = vrot.slane %v3146_v16, %v1667_v52 }
 0x945   : > { %1982 = vmatmul.mubr.msk.bf16.vlgmr.msra.gmra.mxu1 %vm356_vm0, %v1501_v30  ;;  %v1500_v41 = vadd.f32 %v1496_v7, %v1492_v15 }
 0x946   : > { %1610 = vmatprep.mubr.bf16.mxu1 %v2554_v32  ;;  %v2311_v32 = vld [vmem:[%s3252_s7 + $0x8] sm:$0xff]  }
 0x947   : > { %v1502_v17 = vpack.c.bf16 %v1500_v41, %v1499_v10  ;;  %2057 = vmatpush3.bf16.msra.mxu0 %v2311_v32 }
 0x948   : > { %2058 = vmatprep.subr.bf16.mxu0 %v2312_v19 }
 0x94b   : > { %2059 = vmatpush3.bf16.msra.mxu0 %v2313_v35 }
 0x94d   : > { %1983 = vmatmul.mubr.msk.bf16.gmra.mxu1 %vm356_vm0, %v1502_v17 }
 0xa05   : > { %v1602_v55 = vpop.f32.mrf.mxu1 }
 0xa06   : > { %v1603_v37 = vadd.f32 %v1602_v55, %v1515_v18 }
 0xa07   : > { %v1604_v36 = vpop.f32.mrf.mxu1 }
 0xa08   : > { %v1605_v57 = vadd.f32 %v1604_v36, %v1519_v14  ;;  %v1621_v0 = vmax.f32 %v1603_v37, 0.0 }
 0xa09   : > { %v1606_v54 = vpop.f32.mrf.mxu1 }
 0xa0a   : > { %v1607_v58 = vadd.f32 %v1606_v54, %v1515_v18  ;;  %v1622_v39 = vmax.f32 %v1605_v57, 0.0 }
 0xa0b   : > { %v1608_v59 = vpop.f32.mrf.mxu1 }
 0xa0c   : > { %v1609_v38 = vadd.f32 %v1608_v59, %v1519_v14  ;;  %v1623_v1 = vmax.f32 %v1607_v58, 0.0 }
 0xa0d   : > { %v1612_v2 = vpop.f32.mrf.mxu1 }
 0xa0e   : > { %v1624_v31 = vmax.f32 %v1609_v38, 0.0  ;;  %v1629_v34 = vpack.c.bf16 %v1623_v1, %v1621_v0  ;;  %v1613_v51 = vadd.f32 %v1612_v2, %v1515_v18 }
 0xa0f   : > { %v1614_v46 = vpop.f32.mrf.mxu1 }
 0xa10   : > { %v1630_v24 = vpack.c.bf16 %v1624_v31, %v1622_v39  ;;  %v1615_v56 = vadd.f32 %v1614_v46, %v1519_v14  ;;  %v1625_v4 = vmax.f32 %v1613_v51, 0.0 }
 0xa11   : > { %v1616_v22 = vpop.f32.mrf.mxu1 }
 0xa12   : > { %v1617_v42 = vadd.f32 %v1616_v22, %v1515_v18  ;;  %1797 = vmatprep.mubr.bf16.mxu0 %v1630_v24  ;;  %v1626_v47 = vmax.f32 %v1615_v56, 0.0 }
 0xa13   : > { %v1618_v40 = vpop.f32.mrf.mxu1  ;;  %1798 = vmatmul.mubr.bf16.vlgmr.msra.gmra.mxu0 %v1629_v34 }
 0xa14   : > { %v1619_v43 = vadd.f32 %v1618_v40, %v1519_v14  ;;  %v1627_v44 = vmax.f32 %v1617_v42, 0.0 }
 0xa16   : > { %v1628_v48 = vmax.f32 %v1619_v43, 0.0  ;;  %v1631_v8 = vpack.c.bf16 %v1627_v44, %v1625_v4 }
 0xa18   : > { %v1632_v5 = vpack.c.bf16 %v1628_v48, %v1626_v47 }
 0xa1a   : > { %1805 = vmatprep.mubr.bf16.mxu0 %v1632_v5 }
 0xa1b   : > { %1806 = vmatmul.mubr.bf16.gmra.mxu0 %v1631_v8 }
 0xad3   : > { %v2060_v12 = vpop.f32.mrf.mxu0 }
 0xad5   : > { %v2061_v21 = vpop.f32.mrf.mxu0 }
 0xad6   : > { %v2062_v23 = vadd.f32 %v2061_v21, %v2060_v12 }
 0xad7   : > { %v2063_v25 = vpop.f32.mrf.mxu0 }
 0xad8   : > { %v1800_v26 = vadd.f32 %v2062_v23, %v1668_v20 }
 0xad9   : > { %v2064_v7 = vpop.f32.mrf.mxu0 }
 0xada   : > { %v1814_v27 = vadd.f32 %v1800_v26, %v3047_v45  ;;  %v2065_v53 = vadd.f32 %v2064_v7, %v2063_v25 }
 0xadb   : > { %v2066_v29 = vpop.f32.mrf.mxu0 }
 0xadc   : > { %1818 = vst.msk [vmem:[%s341_s13] sm:$0xff] %vm356_vm0, %v1814_v27  ;;  %v1803_v50 = vadd.f32 %v2065_v53, %v1668_v20 }
 0xadd   : > { %v2067_v60 = vpop.f32.mrf.mxu0 }
 0xade   : > { %v1815_v49 = vadd.f32 %v1803_v50, %v3055_v63  ;;  %v2068_v16 = vadd.f32 %v2067_v60, %v2066_v29 }
 0xadf   : > { %v2069_v61 = vpop.f32.mrf.mxu0 }
 0xae0   : > { %1819 = vst.msk [vmem:[%s341_s13 + $0x8] sm:$0xff] %vm356_vm0, %v1815_v49  ;;  %v1808_v6 = vadd.f32 %v2068_v16, %v1668_v20 }
 0xae1   : > { %v2070_v30 = vpop.f32.mrf.mxu0 }
 0xae2   : > { %v1816_v15 = vadd.f32 %v1808_v6, %v3050_v3  ;;  %v2071_v45 = vadd.f32 %v2070_v30, %v2069_v61 }
 0xae4   : > { %1820 = vst.msk [vmem:[%s341_s13 + $0x10] sm:$0xff] %vm356_vm0, %v1816_v15  ;;  %v1811_v9 = vadd.f32 %v2071_v45, %v1668_v20 }
 0xae6   : > { %v1817_v63 = vadd.f32 %v1811_v9, %v3058_v13 }
 0xae8   : > { %1821 = vst.msk [vmem:[%s341_s13 + $0x18] sm:$0xff] %vm356_vm0, %v1817_v63 }
 0xae9   : > { %2490 = shalt.err (!%p2487_p6)
}
 0xaea   : > { %s2491_s21 = scalar_lea.hbm %s3197_s19, 512  ;;  %s2495_s13 = scalar_lea.hbm %s3253_s8, 1024 }
 0xaeb   : > { %p2492_p10 = scmp.ne.s32.totalorder %s3197_s19, %s2491_s21  ;;  %p2496_p11 = scmp.lt.s32.totalorder %s3197_s19, %s3253_s8 }
 0xaec   : > { %p2497_p0 = scmp.lt.s32.totalorder %s2495_s13, %s2491_s21 }
 0xaed   : > { %p2493_p8 = pnand %p2492_p10, %p3266_p2 }
 0xaee   : > { %p2498_p1 = por %p2497_p0, %p2496_p11 }
 0xaef   : > { %p2494_p13 = pneg %p2493_p8 }
 0xaf1   : > { %p2499_p12 = pnand %p2498_p1, %p2494_p13 }
 0xaf3   : > { %2502 = shalt.err (!%p2499_p12)
}
 0xaf4   : > { %s2563_s23 = smov 128   ;;  %s2564_s25 = smov 8  }
 0xaf5   : > { %2168 = dma.vmem_to_hbm [thread:$0]  (%p3266_p2), %s3199_s18, 512, %s3197_s19, %s3205_s9, %s2563_s23, %s2563_s23, %s2564_s25  }
 0xaf6 PF: > { %p2190_p9 = scmp.ge.s32.totalorder %s2545_s30, 2  ;;  %s1851_s26 = sand.u32 1, %s2533_s27  }
 0xaf7   : > { %p3267_p3 = scmp.ne.s32.totalorder %s3258_s16, 0  ;;  %s1852_s10 = scalar_lea.sflag [#allocation4], %s1851_s26 }
 0xaf9   : > { %p2181_p4 = pnand %p2190_p9, %p3267_p3 }
 0xafb   : > { %p2182_p7 = pneg %p2181_p4 }
 0xafd   : > { %2528 = dma.done.wait (%p2182_p7), %s1852_s10, 512  }
 0xafe   : > { %2530 = vsyncadd (%p2182_p7), %s1852_s10, 4294966784  ;;  %p20_p5 = scmp.ge.s32.totalorder %s2635_s11, 4   ;;  %s3268_s27 = smov %s2537_s28 }
 0xaff   : > { %s3269_s28 = smov %s2541_s29  ;;  %s3270_s29 = smov %s2646_s14 }
 0xb00   : > { %s3271_s30 = smov %s2635_s11  ;;  %22 = sbr.rel (!%p20_p5) target bundleno = 5 (0x5), region = 100 }
 0xb05   :  { %1857 = vsyncpa [#allocation3], 1 }
 0xb06   :  { %1859 = vsyncpa [#allocation3 + $0x1], 1 }
 0xb07   :  { %1860 = vsyncpa [#allocation6], 1 }
 0xb08   :  { %1861 = vsyncpa [#allocation4], 1 }
 0xb09   :  { %1863 = vsyncpa [#allocation4 + $0x1], 1 }

</bundles_post_ra>
